<compile_context>
chip_gen: v6e
topology: v6e:2x2x1
jax: 0.10.0
libtpu: 0.0.40
codegen_flags: <defaults>
</compile_context>

<pallas_src>
from functools import partial

import jax
import jax.numpy as jnp
from jax import lax
from jax.experimental import pallas as pl
from jax.experimental.pallas import tpu as pltpu


# ----------------------------- Pallas kernel ------------------------------ #
def lstm_kernel(x_ref,                       # (S, Bp, I)  full sequence
                wih0_ref, whh0_ref, b0_ref,  # layer 0: (I,4H), (H,4H), (1,4H)
                w1cat_ref, b1_ref,           # layer 1: (2H,4H)=[Wih1^T;Whh1^T], (1,4H)
                wreg_ref, breg_ref,          # head:    (H,O),  (1,O)
                out_ref,                     # (S, Bp, O)
                xg0_ref,                     # scratch (S, Bp, 4H): layer-0 input gates
                h2a_ref):                    # scratch (S, Bp, H): top-layer hidden states
    S, Bp, I = x_ref.shape
    H = whh0_ref.shape[0]

    # --- 1) Batch all layer-0 input projections into one MXU call. ----------
    x_flat = x_ref[...].reshape(S * Bp, I)                    # cheap sublane regroup
    xg0 = (jnp.dot(x_flat, wih0_ref[...], preferred_element_type=jnp.float32)
           + b0_ref[...])                                     # bias folded in once
    xg0_ref[...] = xg0.reshape(S, Bp, 4 * H)

    # --- Hoisted loop invariants (JAX does not CSE broadcasts in loops). ----
    whh0 = whh0_ref[...]                                      # (H, 4H)
    w1cat = w1cat_ref[...]                                    # (2H, 4H)
    b1 = jnp.broadcast_to(b1_ref[...], (Bp, 4 * H))           # (Bp, 4H)

    def gates_to_hc(g, c):
        # PyTorch gate layout [i | f | g | o] along the last (4H) dim.
        # Two full-width EUP passes, then lane slices of the results.
        sg = jax.nn.sigmoid(g)                                # (Bp, 4H)
        tg = jnp.tanh(g)                                      # (Bp, 4H)
        i = sg[:, 0 * H:1 * H]
        f = sg[:, 1 * H:2 * H]
        gg = tg[:, 2 * H:3 * H]
        o = sg[:, 3 * H:4 * H]
        c_new = f * c + i * gg
        h_new = o * jnp.tanh(c_new)
        return h_new, c_new

    # --- 2) Sequential recurrence, fully unrolled in-kernel. ----------------
    def step(t, carry):
        h1, c1, h2, c2 = carry
        # layer 0: input projection precomputed; one recurrent MXU push per step
        g0 = xg0_ref[t] + jnp.dot(h1, whh0, preferred_element_type=jnp.float32)
        h1, c1 = gates_to_hc(g0, c1)
        # layer 1: fused [input | recurrent] projection -> single MXU push (K=2H)
        hcat = jnp.concatenate([h1, h2], axis=-1)             # (Bp, 2H)
        g1 = jnp.dot(hcat, w1cat, preferred_element_type=jnp.float32) + b1
        h2, c2 = gates_to_hc(g1, c2)
        h2a_ref[t] = h2
        return (h1, c1, h2, c2)

    z = jnp.zeros((Bp, H), jnp.float32)
    lax.fori_loop(0, S, step, (z, z, z, z), unroll=True)

    # --- 3) Linear head once over all hidden states; single output store. ---
    h2_flat = h2a_ref[...].reshape(S * Bp, H)
    y = (jnp.dot(h2_flat, wreg_ref[...], preferred_element_type=jnp.float32)
         + breg_ref[...])
    out_ref[...] = y.reshape(S, Bp, -1).astype(out_ref.dtype)


# ------------------------------- wrapper ----------------------------------- #
@partial(jax.jit, static_argnames=())
def lstm_module_forward(x, params):
    """x: (S, B, I) float32. Returns (S, 1, O) matching LSTMModule.forward."""
    S, B, I = x.shape
    H = params["whh0"].shape[1]
    O = params["wreg"].shape[0]

    # Pad batch to a sublane multiple (8) so VPU/elementwise tiles are unmasked.
    Bp = max(8, ((B + 7) // 8) * 8)
    x_p = jnp.zeros((S, Bp, I), x.dtype).at[:, :B, :].set(x)

    # Pre-transpose weights so the kernel computes x @ W^T as x @ W_t, and
    # pre-stack layer-1 weights for the fused concat matmul.
    wih0_t = params["wih0"].T                                  # (I, 4H)
    whh0_t = params["whh0"].T                                  # (H, 4H)
    b0 = (params["bih0"] + params["bhh0"]).reshape(1, 4 * H)
    w1cat = jnp.concatenate([params["wih1"].T, params["whh1"].T], axis=0)  # (2H, 4H)
    b1 = (params["bih1"] + params["bhh1"]).reshape(1, 4 * H)
    wreg_t = params["wreg"].T                                  # (H, O)
    breg = params["breg"].reshape(1, O)

    full2 = lambda i: (0, 0)
    full3 = lambda i: (0, 0, 0)

    y = pl.pallas_call(
        lstm_kernel,
        out_shape=jax.ShapeDtypeStruct((S, Bp, O), jnp.float32),
        grid_spec=pltpu.PrefetchScalarGridSpec(
            num_scalar_prefetch=0,
            grid=(1,),
            in_specs=[
                pl.BlockSpec((S, Bp, I), full3),
                pl.BlockSpec((I, 4 * H), full2),
                pl.BlockSpec((H, 4 * H), full2),
                pl.BlockSpec((1, 4 * H), full2),
                pl.BlockSpec((2 * H, 4 * H), full2),
                pl.BlockSpec((1, 4 * H), full2),
                pl.BlockSpec((H, O), full2),
                pl.BlockSpec((1, O), full2),
            ],
            out_specs=pl.BlockSpec((S, Bp, O), full3),
            scratch_shapes=[
                pltpu.VMEM((S, Bp, 4 * H), jnp.float32),   # layer-0 input gates
                pltpu.VMEM((S, Bp, H), jnp.float32),       # top-layer hidden states
            ],
        ),
        compiler_params=pltpu.CompilerParams(
            dimension_semantics=("arbitrary",)),
    )(x_p, wih0_t, whh0_t, b0, w1cat, b1, wreg_t, breg)

    # Matches PyTorch: view(s*b, h) -> Linear -> view(s, b, -1) -> x[:, -1:, :]
    # (batch index B-1 of the ORIGINAL batch; padded rows are discarded).
    return y[:, B - 1:B, :]


# ------------------------- pure-JAX reference ------------------------------ #
def lstm_module_ref(x, p):
    S, B, I = x.shape
    H = p["whh0"].shape[1]

    def cell(h, c, x_t, wih, whh, bih, bhh):
        gates = x_t @ wih.T + h @ whh.T + bih + bhh
        i, f, g, o = jnp.split(gates, 4, axis=-1)
        c = jax.nn.sigmoid(f) * c + jax.nn.sigmoid(i) * jnp.tanh(g)
        h = jax.nn.sigmoid(o) * jnp.tanh(c)
        return h, c

    def step(carry, x_t):
        h1, c1, h2, c2 = carry
        h1, c1 = cell(h1, c1, x_t, p["wih0"], p["whh0"], p["bih0"], p["bhh0"])
        h2, c2 = cell(h2, c2, h1, p["wih1"], p["whh1"], p["bih1"], p["bhh1"])
        return (h1, c1, h2, c2), h2

    z = jnp.zeros((B, H), jnp.float32)
    _, hs = lax.scan(step, (z, z, z, z), x)              # (S, B, H)
    y = hs.reshape(S * B, H) @ p["wreg"].T + p["breg"]
    y = y.reshape(S, B, -1)
    return y[:, -1:, :]


# --------------------------------- main ------------------------------------ #
if __name__ == "__main__":
    SEQ, BATCH = 8, 4
    INPUT_SIZE, HIDDEN_SIZE, OUTPUT_SIZE = 8, 32, 1

    key = jax.random.PRNGKey(0)
    keys = jax.random.split(key, 16)
    k = 1.0 / jnp.sqrt(jnp.float32(HIDDEN_SIZE))
    u = lambda kk, shape: jax.random.uniform(kk, shape, jnp.float32, -k, k)

    params = {
        # layer 0
        "wih0": u(keys[0], (4 * HIDDEN_SIZE, INPUT_SIZE)),
        "whh0": u(keys[1], (4 * HIDDEN_SIZE, HIDDEN_SIZE)),
        "bih0": u(keys[2], (4 * HIDDEN_SIZE,)),
        "bhh0": u(keys[3], (4 * HIDDEN_SIZE,)),
        # layer 1
        "wih1": u(keys[4], (4 * HIDDEN_SIZE, HIDDEN_SIZE)),
        "whh1": u(keys[5], (4 * HIDDEN_SIZE, HIDDEN_SIZE)),
        "bih1": u(keys[6], (4 * HIDDEN_SIZE,)),
        "bhh1": u(keys[7], (4 * HIDDEN_SIZE,)),
        # regression head
        "wreg": u(keys[8], (OUTPUT_SIZE, HIDDEN_SIZE)),
        "breg": u(keys[9], (OUTPUT_SIZE,)),
    }

    x = jax.random.normal(keys[10], (SEQ, BATCH, INPUT_SIZE), jnp.float32)

    out = lstm_module_forward(x, params)
    out = jax.block_until_ready(out)

    ref = lstm_module_ref(x, params)
    assert out.shape == (SEQ, 1, OUTPUT_SIZE), out.shape
    assert jnp.allclose(out, ref, atol=1e-2, rtol=1e-2), float(
        jnp.max(jnp.abs(out - ref)))

    print("KERNEL_OK")
</pallas_src>

<mosaic_0001>
module attributes {stable_mosaic.version = 11 : i64} {
  func.func @lstm_kernel(%arg0: i32, %arg1: memref<8x8x8xf32, #tpu.memory_space<vmem>>, %arg2: memref<8x128xf32, #tpu.memory_space<vmem>>, %arg3: memref<32x128xf32, #tpu.memory_space<vmem>>, %arg4: memref<1x128xf32, #tpu.memory_space<vmem>>, %arg5: memref<64x128xf32, #tpu.memory_space<vmem>>, %arg6: memref<1x128xf32, #tpu.memory_space<vmem>>, %arg7: memref<32x1xf32, #tpu.memory_space<vmem>>, %arg8: memref<1x1xf32, #tpu.memory_space<vmem>>, %arg9: memref<8x8x1xf32, #tpu.memory_space<vmem>>, %arg10: memref<8x8x128xf32, #tpu.memory_space<vmem>>, %arg11: memref<8x8x32xf32, #tpu.memory_space<vmem>>) attributes {dimension_semantics = [#tpu.dimension_semantics<arbitrary>], iteration_bounds = array<i64: 1>, scalar_prefetch = 0 : i64, scratch_operands = 2 : i64, tpu.core_type = #tpu.core_type<tc>, window_params = [{pipeline_mode = #tpu.pipeline_mode<synchronous>, transform_indices = @transform_0, window_bounds = array<i64: 8, 8, 8>}, {pipeline_mode = #tpu.pipeline_mode<synchronous>, transform_indices = @transform_1, window_bounds = array<i64: 8, 128>}, {pipeline_mode = #tpu.pipeline_mode<synchronous>, transform_indices = @transform_2, window_bounds = array<i64: 32, 128>}, {pipeline_mode = #tpu.pipeline_mode<synchronous>, transform_indices = @transform_3, window_bounds = array<i64: 1, 128>}, {pipeline_mode = #tpu.pipeline_mode<synchronous>, transform_indices = @transform_4, window_bounds = array<i64: 64, 128>}, {pipeline_mode = #tpu.pipeline_mode<synchronous>, transform_indices = @transform_5, window_bounds = array<i64: 1, 128>}, {pipeline_mode = #tpu.pipeline_mode<synchronous>, transform_indices = @transform_6, window_bounds = array<i64: 32, 1>}, {pipeline_mode = #tpu.pipeline_mode<synchronous>, transform_indices = @transform_7, window_bounds = array<i64: 1, 1>}, {pipeline_mode = #tpu.pipeline_mode<synchronous>, transform_indices = @transform_8, window_bounds = array<i64: 8, 8, 1>}]} {
    %c0 = arith.constant 0 : index
    %c0_0 = arith.constant 0 : index
    %c0_1 = arith.constant 0 : index
    %0 = vector.load %arg1[%c0, %c0_0, %c0_1] : memref<8x8x8xf32, #tpu.memory_space<vmem>>, vector<8x8x8xf32>
    %1 = vector.shape_cast %0 : vector<8x8x8xf32> to vector<64x8xf32>
    %c0_2 = arith.constant 0 : index
    %c0_3 = arith.constant 0 : index
    %2 = vector.load %arg2[%c0_2, %c0_3] : memref<8x128xf32, #tpu.memory_space<vmem>>, vector<8x128xf32>
    %cst = arith.constant dense<0.000000e+00> : vector<64x128xf32>
    %3 = tpu.matmul %1, %2, %cst {dimension_numbers = #tpu.dot_dimension_numbers<[1], [0], [0], [1], [0, 0, 1, 1], [], []>} : vector<64x8xf32>, vector<8x128xf32>, vector<64x128xf32> -> vector<64x128xf32>
    %c0_4 = arith.constant 0 : index
    %c0_5 = arith.constant 0 : index
    %4 = vector.load %arg4[%c0_4, %c0_5] : memref<1x128xf32, #tpu.memory_space<vmem>>, vector<1x128xf32>
    %5 = vector.broadcast %4 : vector<1x128xf32> to vector<64x128xf32>
    %6 = arith.addf %3, %5 : vector<64x128xf32>
    %7 = vector.shape_cast %6 : vector<64x128xf32> to vector<8x8x128xf32>
    %c0_6 = arith.constant 0 : index
    %c0_7 = arith.constant 0 : index
    %c0_8 = arith.constant 0 : index
    %8 = vector.load %arg10[%c0_6, %c0_7, %c0_8] : memref<8x8x128xf32, #tpu.memory_space<vmem>>, vector<8x8x128xf32>
    tpu.vector_store %arg10[%c0_6, %c0_7, %c0_8], %7 {strides = array<i32>} : memref<8x8x128xf32, #tpu.memory_space<vmem>>, vector<8x8x128xf32>,
    %c0_9 = arith.constant 0 : index
    %c0_10 = arith.constant 0 : index
    %9 = vector.load %arg3[%c0_9, %c0_10] : memref<32x128xf32, #tpu.memory_space<vmem>>, vector<32x128xf32>
    %c0_11 = arith.constant 0 : index
    %c0_12 = arith.constant 0 : index
    %10 = vector.load %arg5[%c0_11, %c0_12] : memref<64x128xf32, #tpu.memory_space<vmem>>, vector<64x128xf32>
    %c0_13 = arith.constant 0 : index
    %c0_14 = arith.constant 0 : index
    %11 = vector.load %arg6[%c0_13, %c0_14] : memref<1x128xf32, #tpu.memory_space<vmem>>, vector<1x128xf32>
    %12 = vector.shape_cast %11 : vector<1x128xf32> to vector<1x128xf32>
    %13 = vector.broadcast %12 : vector<1x128xf32> to vector<8x128xf32>
    %cst_15 = arith.constant 0.000000e+00 : f32
    %14 = vector.broadcast %cst_15 : f32 to vector<8x32xf32>
    %c0_i32 = arith.constant 0 : i32
    %15 = arith.index_cast %c0_i32 : i32 to index
    %c0_16 = arith.constant 0 : index
    %c0_17 = arith.constant 0 : index
    %16 = vector.load %arg10[%15, %c0_16, %c0_17] : memref<8x8x128xf32, #tpu.memory_space<vmem>>, vector<1x8x128xf32>
    %17 = vector.shape_cast %16 : vector<1x8x128xf32> to vector<8x128xf32>
    %cst_18 = arith.constant dense<0.000000e+00> : vector<8x128xf32>
    %18 = tpu.matmul %14, %9, %cst_18 {dimension_numbers = #tpu.dot_dimension_numbers<[1], [0], [0], [1], [0, 0, 1, 1], [], []>} : vector<8x32xf32>, vector<32x128xf32>, vector<8x128xf32> -> vector<8x128xf32>
    %19 = arith.addf %17, %18 : vector<8x128xf32>
    %20 = arith.negf %19 : vector<8x128xf32>
    %21 = math.exp %20 : vector<8x128xf32>
    %cst_19 = arith.constant 1.000000e+00 : f32
    %22 = vector.broadcast %cst_19 : f32 to vector<8x128xf32>
    %23 = arith.addf %22, %21 : vector<8x128xf32>
    %24 = arith.divf %22, %23 : vector<8x128xf32>
    %25 = math.tanh %19 : vector<8x128xf32>
    %26 = vector.extract_strided_slice %24 {offsets = [0, 0], sizes = [8, 32], strides = [1, 1]} : vector<8x128xf32> to vector<8x32xf32>
    %27 = vector.extract_strided_slice %24 {offsets = [0, 32], sizes = [8, 32], strides = [1, 1]} : vector<8x128xf32> to vector<8x32xf32>
    %28 = vector.extract_strided_slice %25 {offsets = [0, 64], sizes = [8, 32], strides = [1, 1]} : vector<8x128xf32> to vector<8x32xf32>
    %29 = vector.extract_strided_slice %24 {offsets = [0, 96], sizes = [8, 32], strides = [1, 1]} : vector<8x128xf32> to vector<8x32xf32>
    %30 = arith.mulf %27, %14 : vector<8x32xf32>
    %31 = arith.mulf %26, %28 : vector<8x32xf32>
    %32 = arith.addf %30, %31 : vector<8x32xf32>
    %33 = math.tanh %32 : vector<8x32xf32>
    %34 = arith.mulf %29, %33 : vector<8x32xf32>
    %35 = tpu.concatenate %34, %14 in 1 : vector<8x32xf32>, vector<8x32xf32> -> vector<8x64xf32>
    %cst_20 = arith.constant dense<0.000000e+00> : vector<8x128xf32>
    %36 = tpu.matmul %35, %10, %cst_20 {dimension_numbers = #tpu.dot_dimension_numbers<[1], [0], [0], [1], [0, 0, 1, 1], [], []>} : vector<8x64xf32>, vector<64x128xf32>, vector<8x128xf32> -> vector<8x128xf32>
    %37 = arith.addf %36, %13 : vector<8x128xf32>
    %38 = arith.negf %37 : vector<8x128xf32>
    %39 = math.exp %38 : vector<8x128xf32>
    %cst_21 = arith.constant 1.000000e+00 : f32
    %40 = vector.broadcast %cst_21 : f32 to vector<8x128xf32>
    %41 = arith.addf %40, %39 : vector<8x128xf32>
    %42 = arith.divf %40, %41 : vector<8x128xf32>
    %43 = math.tanh %37 : vector<8x128xf32>
    %44 = vector.extract_strided_slice %42 {offsets = [0, 0], sizes = [8, 32], strides = [1, 1]} : vector<8x128xf32> to vector<8x32xf32>
    %45 = vector.extract_strided_slice %42 {offsets = [0, 32], sizes = [8, 32], strides = [1, 1]} : vector<8x128xf32> to vector<8x32xf32>
    %46 = vector.extract_strided_slice %43 {offsets = [0, 64], sizes = [8, 32], strides = [1, 1]} : vector<8x128xf32> to vector<8x32xf32>
    %47 = vector.extract_strided_slice %42 {offsets = [0, 96], sizes = [8, 32], strides = [1, 1]} : vector<8x128xf32> to vector<8x32xf32>
    %48 = arith.mulf %45, %14 : vector<8x32xf32>
    %49 = arith.mulf %44, %46 : vector<8x32xf32>
    %50 = arith.addf %48, %49 : vector<8x32xf32>
    %51 = math.tanh %50 : vector<8x32xf32>
    %52 = arith.mulf %47, %51 : vector<8x32xf32>
    %53 = arith.index_cast %c0_i32 : i32 to index
    %c0_22 = arith.constant 0 : index
    %c0_23 = arith.constant 0 : index
    %54 = vector.load %arg11[%53, %c0_22, %c0_23] : memref<8x8x32xf32, #tpu.memory_space<vmem>>, vector<1x8x32xf32>
    %55 = vector.shape_cast %54 : vector<1x8x32xf32> to vector<8x32xf32>
    %56 = vector.shape_cast %52 : vector<8x32xf32> to vector<1x8x32xf32>
    tpu.vector_store %arg11[%53, %c0_22, %c0_23], %56 {strides = array<i32>} : memref<8x8x32xf32, #tpu.memory_space<vmem>>, vector<1x8x32xf32>,
    %c1_i32 = arith.constant 1 : i32
    %57 = arith.index_cast %c1_i32 : i32 to index
    %c0_24 = arith.constant 0 : index
    %c0_25 = arith.constant 0 : index
    %58 = vector.load %arg10[%57, %c0_24, %c0_25] : memref<8x8x128xf32, #tpu.memory_space<vmem>>, vector<1x8x128xf32>
    %59 = vector.shape_cast %58 : vector<1x8x128xf32> to vector<8x128xf32>
    %cst_26 = arith.constant dense<0.000000e+00> : vector<8x128xf32>
    %60 = tpu.matmul %34, %9, %cst_26 {dimension_numbers = #tpu.dot_dimension_numbers<[1], [0], [0], [1], [0, 0, 1, 1], [], []>} : vector<8x32xf32>, vector<32x128xf32>, vector<8x128xf32> -> vector<8x128xf32>
    %61 = arith.addf %59, %60 : vector<8x128xf32>
    %62 = arith.negf %61 : vector<8x128xf32>
    %63 = math.exp %62 : vector<8x128xf32>
    %cst_27 = arith.constant 1.000000e+00 : f32
    %64 = vector.broadcast %cst_27 : f32 to vector<8x128xf32>
    %65 = arith.addf %64, %63 : vector<8x128xf32>
    %66 = arith.divf %64, %65 : vector<8x128xf32>
    %67 = math.tanh %61 : vector<8x128xf32>
    %68 = vector.extract_strided_slice %66 {offsets = [0, 0], sizes = [8, 32], strides = [1, 1]} : vector<8x128xf32> to vector<8x32xf32>
    %69 = vector.extract_strided_slice %66 {offsets = [0, 32], sizes = [8, 32], strides = [1, 1]} : vector<8x128xf32> to vector<8x32xf32>
    %70 = vector.extract_strided_slice %67 {offsets = [0, 64], sizes = [8, 32], strides = [1, 1]} : vector<8x128xf32> to vector<8x32xf32>
    %71 = vector.extract_strided_slice %66 {offsets = [0, 96], sizes = [8, 32], strides = [1, 1]} : vector<8x128xf32> to vector<8x32xf32>
    %72 = arith.mulf %69, %32 : vector<8x32xf32>
    %73 = arith.mulf %68, %70 : vector<8x32xf32>
    %74 = arith.addf %72, %73 : vector<8x32xf32>
    %75 = math.tanh %74 : vector<8x32xf32>
    %76 = arith.mulf %71, %75 : vector<8x32xf32>
    %77 = tpu.concatenate %76, %52 in 1 : vector<8x32xf32>, vector<8x32xf32> -> vector<8x64xf32>
    %cst_28 = arith.constant dense<0.000000e+00> : vector<8x128xf32>
    %78 = tpu.matmul %77, %10, %cst_28 {dimension_numbers = #tpu.dot_dimension_numbers<[1], [0], [0], [1], [0, 0, 1, 1], [], []>} : vector<8x64xf32>, vector<64x128xf32>, vector<8x128xf32> -> vector<8x128xf32>
    %79 = arith.addf %78, %13 : vector<8x128xf32>
    %80 = arith.negf %79 : vector<8x128xf32>
    %81 = math.exp %80 : vector<8x128xf32>
    %cst_29 = arith.constant 1.000000e+00 : f32
    %82 = vector.broadcast %cst_29 : f32 to vector<8x128xf32>
    %83 = arith.addf %82, %81 : vector<8x128xf32>
    %84 = arith.divf %82, %83 : vector<8x128xf32>
    %85 = math.tanh %79 : vector<8x128xf32>
    %86 = vector.extract_strided_slice %84 {offsets = [0, 0], sizes = [8, 32], strides = [1, 1]} : vector<8x128xf32> to vector<8x32xf32>
    %87 = vector.extract_strided_slice %84 {offsets = [0, 32], sizes = [8, 32], strides = [1, 1]} : vector<8x128xf32> to vector<8x32xf32>
    %88 = vector.extract_strided_slice %85 {offsets = [0, 64], sizes = [8, 32], strides = [1, 1]} : vector<8x128xf32> to vector<8x32xf32>
    %89 = vector.extract_strided_slice %84 {offsets = [0, 96], sizes = [8, 32], strides = [1, 1]} : vector<8x128xf32> to vector<8x32xf32>
    %90 = arith.mulf %87, %50 : vector<8x32xf32>
    %91 = arith.mulf %86, %88 : vector<8x32xf32>
    %92 = arith.addf %90, %91 : vector<8x32xf32>
    %93 = math.tanh %92 : vector<8x32xf32>
    %94 = arith.mulf %89, %93 : vector<8x32xf32>
    %95 = arith.index_cast %c1_i32 : i32 to index
    %c0_30 = arith.constant 0 : index
    %c0_31 = arith.constant 0 : index
    %96 = vector.load %arg11[%95, %c0_30, %c0_31] : memref<8x8x32xf32, #tpu.memory_space<vmem>>, vector<1x8x32xf32>
    %97 = vector.shape_cast %96 : vector<1x8x32xf32> to vector<8x32xf32>
    %98 = vector.shape_cast %94 : vector<8x32xf32> to vector<1x8x32xf32>
    tpu.vector_store %arg11[%95, %c0_30, %c0_31], %98 {strides = array<i32>} : memref<8x8x32xf32, #tpu.memory_space<vmem>>, vector<1x8x32xf32>,
    %c2_i32 = arith.constant 2 : i32
    %99 = arith.index_cast %c2_i32 : i32 to index
    %c0_32 = arith.constant 0 : index
    %c0_33 = arith.constant 0 : index
    %100 = vector.load %arg10[%99, %c0_32, %c0_33] : memref<8x8x128xf32, #tpu.memory_space<vmem>>, vector<1x8x128xf32>
    %101 = vector.shape_cast %100 : vector<1x8x128xf32> to vector<8x128xf32>
    %cst_34 = arith.constant dense<0.000000e+00> : vector<8x128xf32>
    %102 = tpu.matmul %76, %9, %cst_34 {dimension_numbers = #tpu.dot_dimension_numbers<[1], [0], [0], [1], [0, 0, 1, 1], [], []>} : vector<8x32xf32>, vector<32x128xf32>, vector<8x128xf32> -> vector<8x128xf32>
    %103 = arith.addf %101, %102 : vector<8x128xf32>
    %104 = arith.negf %103 : vector<8x128xf32>
    %105 = math.exp %104 : vector<8x128xf32>
    %cst_35 = arith.constant 1.000000e+00 : f32
    %106 = vector.broadcast %cst_35 : f32 to vector<8x128xf32>
    %107 = arith.addf %106, %105 : vector<8x128xf32>
    %108 = arith.divf %106, %107 : vector<8x128xf32>
    %109 = math.tanh %103 : vector<8x128xf32>
    %110 = vector.extract_strided_slice %108 {offsets = [0, 0], sizes = [8, 32], strides = [1, 1]} : vector<8x128xf32> to vector<8x32xf32>
    %111 = vector.extract_strided_slice %108 {offsets = [0, 32], sizes = [8, 32], strides = [1, 1]} : vector<8x128xf32> to vector<8x32xf32>
    %112 = vector.extract_strided_slice %109 {offsets = [0, 64], sizes = [8, 32], strides = [1, 1]} : vector<8x128xf32> to vector<8x32xf32>
    %113 = vector.extract_strided_slice %108 {offsets = [0, 96], sizes = [8, 32], strides = [1, 1]} : vector<8x128xf32> to vector<8x32xf32>
    %114 = arith.mulf %111, %74 : vector<8x32xf32>
    %115 = arith.mulf %110, %112 : vector<8x32xf32>
    %116 = arith.addf %114, %115 : vector<8x32xf32>
    %117 = math.tanh %116 : vector<8x32xf32>
    %118 = arith.mulf %113, %117 : vector<8x32xf32>
    %119 = tpu.concatenate %118, %94 in 1 : vector<8x32xf32>, vector<8x32xf32> -> vector<8x64xf32>
    %cst_36 = arith.constant dense<0.000000e+00> : vector<8x128xf32>
    %120 = tpu.matmul %119, %10, %cst_36 {dimension_numbers = #tpu.dot_dimension_numbers<[1], [0], [0], [1], [0, 0, 1, 1], [], []>} : vector<8x64xf32>, vector<64x128xf32>, vector<8x128xf32> -> vector<8x128xf32>
    %121 = arith.addf %120, %13 : vector<8x128xf32>
    %122 = arith.negf %121 : vector<8x128xf32>
    %123 = math.exp %122 : vector<8x128xf32>
    %cst_37 = arith.constant 1.000000e+00 : f32
    %124 = vector.broadcast %cst_37 : f32 to vector<8x128xf32>
    %125 = arith.addf %124, %123 : vector<8x128xf32>
    %126 = arith.divf %124, %125 : vector<8x128xf32>
    %127 = math.tanh %121 : vector<8x128xf32>
    %128 = vector.extract_strided_slice %126 {offsets = [0, 0], sizes = [8, 32], strides = [1, 1]} : vector<8x128xf32> to vector<8x32xf32>
    %129 = vector.extract_strided_slice %126 {offsets = [0, 32], sizes = [8, 32], strides = [1, 1]} : vector<8x128xf32> to vector<8x32xf32>
    %130 = vector.extract_strided_slice %127 {offsets = [0, 64], sizes = [8, 32], strides = [1, 1]} : vector<8x128xf32> to vector<8x32xf32>
    %131 = vector.extract_strided_slice %126 {offsets = [0, 96], sizes = [8, 32], strides = [1, 1]} : vector<8x128xf32> to vector<8x32xf32>
    %132 = arith.mulf %129, %92 : vector<8x32xf32>
    %133 = arith.mulf %128, %130 : vector<8x32xf32>
    %134 = arith.addf %132, %133 : vector<8x32xf32>
    %135 = math.tanh %134 : vector<8x32xf32>
    %136 = arith.mulf %131, %135 : vector<8x32xf32>
    %137 = arith.index_cast %c2_i32 : i32 to index
    %c0_38 = arith.constant 0 : index
    %c0_39 = arith.constant 0 : index
    %138 = vector.load %arg11[%137, %c0_38, %c0_39] : memref<8x8x32xf32, #tpu.memory_space<vmem>>, vector<1x8x32xf32>
    %139 = vector.shape_cast %138 : vector<1x8x32xf32> to vector<8x32xf32>
    %140 = vector.shape_cast %136 : vector<8x32xf32> to vector<1x8x32xf32>
    tpu.vector_store %arg11[%137, %c0_38, %c0_39], %140 {strides = array<i32>} : memref<8x8x32xf32, #tpu.memory_space<vmem>>, vector<1x8x32xf32>,
    %c3_i32 = arith.constant 3 : i32
    %141 = arith.index_cast %c3_i32 : i32 to index
    %c0_40 = arith.constant 0 : index
    %c0_41 = arith.constant 0 : index
    %142 = vector.load %arg10[%141, %c0_40, %c0_41] : memref<8x8x128xf32, #tpu.memory_space<vmem>>, vector<1x8x128xf32>
    %143 = vector.shape_cast %142 : vector<1x8x128xf32> to vector<8x128xf32>
    %cst_42 = arith.constant dense<0.000000e+00> : vector<8x128xf32>
    %144 = tpu.matmul %118, %9, %cst_42 {dimension_numbers = #tpu.dot_dimension_numbers<[1], [0], [0], [1], [0, 0, 1, 1], [], []>} : vector<8x32xf32>, vector<32x128xf32>, vector<8x128xf32> -> vector<8x128xf32>
    %145 = arith.addf %143, %144 : vector<8x128xf32>
    %146 = arith.negf %145 : vector<8x128xf32>
    %147 = math.exp %146 : vector<8x128xf32>
    %cst_43 = arith.constant 1.000000e+00 : f32
    %148 = vector.broadcast %cst_43 : f32 to vector<8x128xf32>
    %149 = arith.addf %148, %147 : vector<8x128xf32>
    %150 = arith.divf %148, %149 : vector<8x128xf32>
    %151 = math.tanh %145 : vector<8x128xf32>
    %152 = vector.extract_strided_slice %150 {offsets = [0, 0], sizes = [8, 32], strides = [1, 1]} : vector<8x128xf32> to vector<8x32xf32>
    %153 = vector.extract_strided_slice %150 {offsets = [0, 32], sizes = [8, 32], strides = [1, 1]} : vector<8x128xf32> to vector<8x32xf32>
    %154 = vector.extract_strided_slice %151 {offsets = [0, 64], sizes = [8, 32], strides = [1, 1]} : vector<8x128xf32> to vector<8x32xf32>
    %155 = vector.extract_strided_slice %150 {offsets = [0, 96], sizes = [8, 32], strides = [1, 1]} : vector<8x128xf32> to vector<8x32xf32>
    %156 = arith.mulf %153, %116 : vector<8x32xf32>
    %157 = arith.mulf %152, %154 : vector<8x32xf32>
    %158 = arith.addf %156, %157 : vector<8x32xf32>
    %159 = math.tanh %158 : vector<8x32xf32>
    %160 = arith.mulf %155, %159 : vector<8x32xf32>
    %161 = tpu.concatenate %160, %136 in 1 : vector<8x32xf32>, vector<8x32xf32> -> vector<8x64xf32>
    %cst_44 = arith.constant dense<0.000000e+00> : vector<8x128xf32>
    %162 = tpu.matmul %161, %10, %cst_44 {dimension_numbers = #tpu.dot_dimension_numbers<[1], [0], [0], [1], [0, 0, 1, 1], [], []>} : vector<8x64xf32>, vector<64x128xf32>, vector<8x128xf32> -> vector<8x128xf32>
    %163 = arith.addf %162, %13 : vector<8x128xf32>
    %164 = arith.negf %163 : vector<8x128xf32>
    %165 = math.exp %164 : vector<8x128xf32>
    %cst_45 = arith.constant 1.000000e+00 : f32
    %166 = vector.broadcast %cst_45 : f32 to vector<8x128xf32>
    %167 = arith.addf %166, %165 : vector<8x128xf32>
    %168 = arith.divf %166, %167 : vector<8x128xf32>
    %169 = math.tanh %163 : vector<8x128xf32>
    %170 = vector.extract_strided_slice %168 {offsets = [0, 0], sizes = [8, 32], strides = [1, 1]} : vector<8x128xf32> to vector<8x32xf32>
    %171 = vector.extract_strided_slice %168 {offsets = [0, 32], sizes = [8, 32], strides = [1, 1]} : vector<8x128xf32> to vector<8x32xf32>
    %172 = vector.extract_strided_slice %169 {offsets = [0, 64], sizes = [8, 32], strides = [1, 1]} : vector<8x128xf32> to vector<8x32xf32>
    %173 = vector.extract_strided_slice %168 {offsets = [0, 96], sizes = [8, 32], strides = [1, 1]} : vector<8x128xf32> to vector<8x32xf32>
    %174 = arith.mulf %171, %134 : vector<8x32xf32>
    %175 = arith.mulf %170, %172 : vector<8x32xf32>
    %176 = arith.addf %174, %175 : vector<8x32xf32>
    %177 = math.tanh %176 : vector<8x32xf32>
    %178 = arith.mulf %173, %177 : vector<8x32xf32>
    %179 = arith.index_cast %c3_i32 : i32 to index
    %c0_46 = arith.constant 0 : index
    %c0_47 = arith.constant 0 : index
    %180 = vector.load %arg11[%179, %c0_46, %c0_47] : memref<8x8x32xf32, #tpu.memory_space<vmem>>, vector<1x8x32xf32>
    %181 = vector.shape_cast %180 : vector<1x8x32xf32> to vector<8x32xf32>
    %182 = vector.shape_cast %178 : vector<8x32xf32> to vector<1x8x32xf32>
    tpu.vector_store %arg11[%179, %c0_46, %c0_47], %182 {strides = array<i32>} : memref<8x8x32xf32, #tpu.memory_space<vmem>>, vector<1x8x32xf32>,
    %c4_i32 = arith.constant 4 : i32
    %183 = arith.index_cast %c4_i32 : i32 to index
    %c0_48 = arith.constant 0 : index
    %c0_49 = arith.constant 0 : index
    %184 = vector.load %arg10[%183, %c0_48, %c0_49] : memref<8x8x128xf32, #tpu.memory_space<vmem>>, vector<1x8x128xf32>
    %185 = vector.shape_cast %184 : vector<1x8x128xf32> to vector<8x128xf32>
    %cst_50 = arith.constant dense<0.000000e+00> : vector<8x128xf32>
    %186 = tpu.matmul %160, %9, %cst_50 {dimension_numbers = #tpu.dot_dimension_numbers<[1], [0], [0], [1], [0, 0, 1, 1], [], []>} : vector<8x32xf32>, vector<32x128xf32>, vector<8x128xf32> -> vector<8x128xf32>
    %187 = arith.addf %185, %186 : vector<8x128xf32>
    %188 = arith.negf %187 : vector<8x128xf32>
    %189 = math.exp %188 : vector<8x128xf32>
    %cst_51 = arith.constant 1.000000e+00 : f32
    %190 = vector.broadcast %cst_51 : f32 to vector<8x128xf32>
    %191 = arith.addf %190, %189 : vector<8x128xf32>
    %192 = arith.divf %190, %191 : vector<8x128xf32>
    %193 = math.tanh %187 : vector<8x128xf32>
    %194 = vector.extract_strided_slice %192 {offsets = [0, 0], sizes = [8, 32], strides = [1, 1]} : vector<8x128xf32> to vector<8x32xf32>
    %195 = vector.extract_strided_slice %192 {offsets = [0, 32], sizes = [8, 32], strides = [1, 1]} : vector<8x128xf32> to vector<8x32xf32>
    %196 = vector.extract_strided_slice %193 {offsets = [0, 64], sizes = [8, 32], strides = [1, 1]} : vector<8x128xf32> to vector<8x32xf32>
    %197 = vector.extract_strided_slice %192 {offsets = [0, 96], sizes = [8, 32], strides = [1, 1]} : vector<8x128xf32> to vector<8x32xf32>
    %198 = arith.mulf %195, %158 : vector<8x32xf32>
    %199 = arith.mulf %194, %196 : vector<8x32xf32>
    %200 = arith.addf %198, %199 : vector<8x32xf32>
    %201 = math.tanh %200 : vector<8x32xf32>
    %202 = arith.mulf %197, %201 : vector<8x32xf32>
    %203 = tpu.concatenate %202, %178 in 1 : vector<8x32xf32>, vector<8x32xf32> -> vector<8x64xf32>
    %cst_52 = arith.constant dense<0.000000e+00> : vector<8x128xf32>
    %204 = tpu.matmul %203, %10, %cst_52 {dimension_numbers = #tpu.dot_dimension_numbers<[1], [0], [0], [1], [0, 0, 1, 1], [], []>} : vector<8x64xf32>, vector<64x128xf32>, vector<8x128xf32> -> vector<8x128xf32>
    %205 = arith.addf %204, %13 : vector<8x128xf32>
    %206 = arith.negf %205 : vector<8x128xf32>
    %207 = math.exp %206 : vector<8x128xf32>
    %cst_53 = arith.constant 1.000000e+00 : f32
    %208 = vector.broadcast %cst_53 : f32 to vector<8x128xf32>
    %209 = arith.addf %208, %207 : vector<8x128xf32>
    %210 = arith.divf %208, %209 : vector<8x128xf32>
    %211 = math.tanh %205 : vector<8x128xf32>
    %212 = vector.extract_strided_slice %210 {offsets = [0, 0], sizes = [8, 32], strides = [1, 1]} : vector<8x128xf32> to vector<8x32xf32>
    %213 = vector.extract_strided_slice %210 {offsets = [0, 32], sizes = [8, 32], strides = [1, 1]} : vector<8x128xf32> to vector<8x32xf32>
    %214 = vector.extract_strided_slice %211 {offsets = [0, 64], sizes = [8, 32], strides = [1, 1]} : vector<8x128xf32> to vector<8x32xf32>
    %215 = vector.extract_strided_slice %210 {offsets = [0, 96], sizes = [8, 32], strides = [1, 1]} : vector<8x128xf32> to vector<8x32xf32>
    %216 = arith.mulf %213, %176 : vector<8x32xf32>
    %217 = arith.mulf %212, %214 : vector<8x32xf32>
    %218 = arith.addf %216, %217 : vector<8x32xf32>
    %219 = math.tanh %218 : vector<8x32xf32>
    %220 = arith.mulf %215, %219 : vector<8x32xf32>
    %221 = arith.index_cast %c4_i32 : i32 to index
    %c0_54 = arith.constant 0 : index
    %c0_55 = arith.constant 0 : index
    %222 = vector.load %arg11[%221, %c0_54, %c0_55] : memref<8x8x32xf32, #tpu.memory_space<vmem>>, vector<1x8x32xf32>
    %223 = vector.shape_cast %222 : vector<1x8x32xf32> to vector<8x32xf32>
    %224 = vector.shape_cast %220 : vector<8x32xf32> to vector<1x8x32xf32>
    tpu.vector_store %arg11[%221, %c0_54, %c0_55], %224 {strides = array<i32>} : memref<8x8x32xf32, #tpu.memory_space<vmem>>, vector<1x8x32xf32>,
    %c5_i32 = arith.constant 5 : i32
    %225 = arith.index_cast %c5_i32 : i32 to index
    %c0_56 = arith.constant 0 : index
    %c0_57 = arith.constant 0 : index
    %226 = vector.load %arg10[%225, %c0_56, %c0_57] : memref<8x8x128xf32, #tpu.memory_space<vmem>>, vector<1x8x128xf32>
    %227 = vector.shape_cast %226 : vector<1x8x128xf32> to vector<8x128xf32>
    %cst_58 = arith.constant dense<0.000000e+00> : vector<8x128xf32>
    %228 = tpu.matmul %202, %9, %cst_58 {dimension_numbers = #tpu.dot_dimension_numbers<[1], [0], [0], [1], [0, 0, 1, 1], [], []>} : vector<8x32xf32>, vector<32x128xf32>, vector<8x128xf32> -> vector<8x128xf32>
    %229 = arith.addf %227, %228 : vector<8x128xf32>
    %230 = arith.negf %229 : vector<8x128xf32>
    %231 = math.exp %230 : vector<8x128xf32>
    %cst_59 = arith.constant 1.000000e+00 : f32
    %232 = vector.broadcast %cst_59 : f32 to vector<8x128xf32>
    %233 = arith.addf %232, %231 : vector<8x128xf32>
    %234 = arith.divf %232, %233 : vector<8x128xf32>
    %235 = math.tanh %229 : vector<8x128xf32>
    %236 = vector.extract_strided_slice %234 {offsets = [0, 0], sizes = [8, 32], strides = [1, 1]} : vector<8x128xf32> to vector<8x32xf32>
    %237 = vector.extract_strided_slice %234 {offsets = [0, 32], sizes = [8, 32], strides = [1, 1]} : vector<8x128xf32> to vector<8x32xf32>
    %238 = vector.extract_strided_slice %235 {offsets = [0, 64], sizes = [8, 32], strides = [1, 1]} : vector<8x128xf32> to vector<8x32xf32>
    %239 = vector.extract_strided_slice %234 {offsets = [0, 96], sizes = [8, 32], strides = [1, 1]} : vector<8x128xf32> to vector<8x32xf32>
    %240 = arith.mulf %237, %200 : vector<8x32xf32>
    %241 = arith.mulf %236, %238 : vector<8x32xf32>
    %242 = arith.addf %240, %241 : vector<8x32xf32>
    %243 = math.tanh %242 : vector<8x32xf32>
    %244 = arith.mulf %239, %243 : vector<8x32xf32>
    %245 = tpu.concatenate %244, %220 in 1 : vector<8x32xf32>, vector<8x32xf32> -> vector<8x64xf32>
    %cst_60 = arith.constant dense<0.000000e+00> : vector<8x128xf32>
    %246 = tpu.matmul %245, %10, %cst_60 {dimension_numbers = #tpu.dot_dimension_numbers<[1], [0], [0], [1], [0, 0, 1, 1], [], []>} : vector<8x64xf32>, vector<64x128xf32>, vector<8x128xf32> -> vector<8x128xf32>
    %247 = arith.addf %246, %13 : vector<8x128xf32>
    %248 = arith.negf %247 : vector<8x128xf32>
    %249 = math.exp %248 : vector<8x128xf32>
    %cst_61 = arith.constant 1.000000e+00 : f32
    %250 = vector.broadcast %cst_61 : f32 to vector<8x128xf32>
    %251 = arith.addf %250, %249 : vector<8x128xf32>
    %252 = arith.divf %250, %251 : vector<8x128xf32>
    %253 = math.tanh %247 : vector<8x128xf32>
    %254 = vector.extract_strided_slice %252 {offsets = [0, 0], sizes = [8, 32], strides = [1, 1]} : vector<8x128xf32> to vector<8x32xf32>
    %255 = vector.extract_strided_slice %252 {offsets = [0, 32], sizes = [8, 32], strides = [1, 1]} : vector<8x128xf32> to vector<8x32xf32>
    %256 = vector.extract_strided_slice %253 {offsets = [0, 64], sizes = [8, 32], strides = [1, 1]} : vector<8x128xf32> to vector<8x32xf32>
    %257 = vector.extract_strided_slice %252 {offsets = [0, 96], sizes = [8, 32], strides = [1, 1]} : vector<8x128xf32> to vector<8x32xf32>
    %258 = arith.mulf %255, %218 : vector<8x32xf32>
    %259 = arith.mulf %254, %256 : vector<8x32xf32>
    %260 = arith.addf %258, %259 : vector<8x32xf32>
    %261 = math.tanh %260 : vector<8x32xf32>
    %262 = arith.mulf %257, %261 : vector<8x32xf32>
    %263 = arith.index_cast %c5_i32 : i32 to index
    %c0_62 = arith.constant 0 : index
    %c0_63 = arith.constant 0 : index
    %264 = vector.load %arg11[%263, %c0_62, %c0_63] : memref<8x8x32xf32, #tpu.memory_space<vmem>>, vector<1x8x32xf32>
    %265 = vector.shape_cast %264 : vector<1x8x32xf32> to vector<8x32xf32>
    %266 = vector.shape_cast %262 : vector<8x32xf32> to vector<1x8x32xf32>
    tpu.vector_store %arg11[%263, %c0_62, %c0_63], %266 {strides = array<i32>} : memref<8x8x32xf32, #tpu.memory_space<vmem>>, vector<1x8x32xf32>,
    %c6_i32 = arith.constant 6 : i32
    %267 = arith.index_cast %c6_i32 : i32 to index
    %c0_64 = arith.constant 0 : index
    %c0_65 = arith.constant 0 : index
    %268 = vector.load %arg10[%267, %c0_64, %c0_65] : memref<8x8x128xf32, #tpu.memory_space<vmem>>, vector<1x8x128xf32>
    %269 = vector.shape_cast %268 : vector<1x8x128xf32> to vector<8x128xf32>
    %cst_66 = arith.constant dense<0.000000e+00> : vector<8x128xf32>
    %270 = tpu.matmul %244, %9, %cst_66 {dimension_numbers = #tpu.dot_dimension_numbers<[1], [0], [0], [1], [0, 0, 1, 1], [], []>} : vector<8x32xf32>, vector<32x128xf32>, vector<8x128xf32> -> vector<8x128xf32>
    %271 = arith.addf %269, %270 : vector<8x128xf32>
    %272 = arith.negf %271 : vector<8x128xf32>
    %273 = math.exp %272 : vector<8x128xf32>
    %cst_67 = arith.constant 1.000000e+00 : f32
    %274 = vector.broadcast %cst_67 : f32 to vector<8x128xf32>
    %275 = arith.addf %274, %273 : vector<8x128xf32>
    %276 = arith.divf %274, %275 : vector<8x128xf32>
    %277 = math.tanh %271 : vector<8x128xf32>
    %278 = vector.extract_strided_slice %276 {offsets = [0, 0], sizes = [8, 32], strides = [1, 1]} : vector<8x128xf32> to vector<8x32xf32>
    %279 = vector.extract_strided_slice %276 {offsets = [0, 32], sizes = [8, 32], strides = [1, 1]} : vector<8x128xf32> to vector<8x32xf32>
    %280 = vector.extract_strided_slice %277 {offsets = [0, 64], sizes = [8, 32], strides = [1, 1]} : vector<8x128xf32> to vector<8x32xf32>
    %281 = vector.extract_strided_slice %276 {offsets = [0, 96], sizes = [8, 32], strides = [1, 1]} : vector<8x128xf32> to vector<8x32xf32>
    %282 = arith.mulf %279, %242 : vector<8x32xf32>
    %283 = arith.mulf %278, %280 : vector<8x32xf32>
    %284 = arith.addf %282, %283 : vector<8x32xf32>
    %285 = math.tanh %284 : vector<8x32xf32>
    %286 = arith.mulf %281, %285 : vector<8x32xf32>
    %287 = tpu.concatenate %286, %262 in 1 : vector<8x32xf32>, vector<8x32xf32> -> vector<8x64xf32>
    %cst_68 = arith.constant dense<0.000000e+00> : vector<8x128xf32>
    %288 = tpu.matmul %287, %10, %cst_68 {dimension_numbers = #tpu.dot_dimension_numbers<[1], [0], [0], [1], [0, 0, 1, 1], [], []>} : vector<8x64xf32>, vector<64x128xf32>, vector<8x128xf32> -> vector<8x128xf32>
    %289 = arith.addf %288, %13 : vector<8x128xf32>
    %290 = arith.negf %289 : vector<8x128xf32>
    %291 = math.exp %290 : vector<8x128xf32>
    %cst_69 = arith.constant 1.000000e+00 : f32
    %292 = vector.broadcast %cst_69 : f32 to vector<8x128xf32>
    %293 = arith.addf %292, %291 : vector<8x128xf32>
    %294 = arith.divf %292, %293 : vector<8x128xf32>
    %295 = math.tanh %289 : vector<8x128xf32>
    %296 = vector.extract_strided_slice %294 {offsets = [0, 0], sizes = [8, 32], strides = [1, 1]} : vector<8x128xf32> to vector<8x32xf32>
    %297 = vector.extract_strided_slice %294 {offsets = [0, 32], sizes = [8, 32], strides = [1, 1]} : vector<8x128xf32> to vector<8x32xf32>
    %298 = vector.extract_strided_slice %295 {offsets = [0, 64], sizes = [8, 32], strides = [1, 1]} : vector<8x128xf32> to vector<8x32xf32>
    %299 = vector.extract_strided_slice %294 {offsets = [0, 96], sizes = [8, 32], strides = [1, 1]} : vector<8x128xf32> to vector<8x32xf32>
    %300 = arith.mulf %297, %260 : vector<8x32xf32>
    %301 = arith.mulf %296, %298 : vector<8x32xf32>
    %302 = arith.addf %300, %301 : vector<8x32xf32>
    %303 = math.tanh %302 : vector<8x32xf32>
    %304 = arith.mulf %299, %303 : vector<8x32xf32>
    %305 = arith.index_cast %c6_i32 : i32 to index
    %c0_70 = arith.constant 0 : index
    %c0_71 = arith.constant 0 : index
    %306 = vector.load %arg11[%305, %c0_70, %c0_71] : memref<8x8x32xf32, #tpu.memory_space<vmem>>, vector<1x8x32xf32>
    %307 = vector.shape_cast %306 : vector<1x8x32xf32> to vector<8x32xf32>
    %308 = vector.shape_cast %304 : vector<8x32xf32> to vector<1x8x32xf32>
    tpu.vector_store %arg11[%305, %c0_70, %c0_71], %308 {strides = array<i32>} : memref<8x8x32xf32, #tpu.memory_space<vmem>>, vector<1x8x32xf32>,
    %c7_i32 = arith.constant 7 : i32
    %309 = arith.index_cast %c7_i32 : i32 to index
    %c0_72 = arith.constant 0 : index
    %c0_73 = arith.constant 0 : index
    %310 = vector.load %arg10[%309, %c0_72, %c0_73] : memref<8x8x128xf32, #tpu.memory_space<vmem>>, vector<1x8x128xf32>
    %311 = vector.shape_cast %310 : vector<1x8x128xf32> to vector<8x128xf32>
    %cst_74 = arith.constant dense<0.000000e+00> : vector<8x128xf32>
    %312 = tpu.matmul %286, %9, %cst_74 {dimension_numbers = #tpu.dot_dimension_numbers<[1], [0], [0], [1], [0, 0, 1, 1], [], []>} : vector<8x32xf32>, vector<32x128xf32>, vector<8x128xf32> -> vector<8x128xf32>
    %313 = arith.addf %311, %312 : vector<8x128xf32>
    %314 = arith.negf %313 : vector<8x128xf32>
    %315 = math.exp %314 : vector<8x128xf32>
    %cst_75 = arith.constant 1.000000e+00 : f32
    %316 = vector.broadcast %cst_75 : f32 to vector<8x128xf32>
    %317 = arith.addf %316, %315 : vector<8x128xf32>
    %318 = arith.divf %316, %317 : vector<8x128xf32>
    %319 = math.tanh %313 : vector<8x128xf32>
    %320 = vector.extract_strided_slice %318 {offsets = [0, 0], sizes = [8, 32], strides = [1, 1]} : vector<8x128xf32> to vector<8x32xf32>
    %321 = vector.extract_strided_slice %318 {offsets = [0, 32], sizes = [8, 32], strides = [1, 1]} : vector<8x128xf32> to vector<8x32xf32>
    %322 = vector.extract_strided_slice %319 {offsets = [0, 64], sizes = [8, 32], strides = [1, 1]} : vector<8x128xf32> to vector<8x32xf32>
    %323 = vector.extract_strided_slice %318 {offsets = [0, 96], sizes = [8, 32], strides = [1, 1]} : vector<8x128xf32> to vector<8x32xf32>
    %324 = arith.mulf %321, %284 : vector<8x32xf32>
    %325 = arith.mulf %320, %322 : vector<8x32xf32>
    %326 = arith.addf %324, %325 : vector<8x32xf32>
    %327 = math.tanh %326 : vector<8x32xf32>
    %328 = arith.mulf %323, %327 : vector<8x32xf32>
    %329 = tpu.concatenate %328, %304 in 1 : vector<8x32xf32>, vector<8x32xf32> -> vector<8x64xf32>
    %cst_76 = arith.constant dense<0.000000e+00> : vector<8x128xf32>
    %330 = tpu.matmul %329, %10, %cst_76 {dimension_numbers = #tpu.dot_dimension_numbers<[1], [0], [0], [1], [0, 0, 1, 1], [], []>} : vector<8x64xf32>, vector<64x128xf32>, vector<8x128xf32> -> vector<8x128xf32>
    %331 = arith.addf %330, %13 : vector<8x128xf32>
    %332 = arith.negf %331 : vector<8x128xf32>
    %333 = math.exp %332 : vector<8x128xf32>
    %cst_77 = arith.constant 1.000000e+00 : f32
    %334 = vector.broadcast %cst_77 : f32 to vector<8x128xf32>
    %335 = arith.addf %334, %333 : vector<8x128xf32>
    %336 = arith.divf %334, %335 : vector<8x128xf32>
    %337 = math.tanh %331 : vector<8x128xf32>
    %338 = vector.extract_strided_slice %336 {offsets = [0, 0], sizes = [8, 32], strides = [1, 1]} : vector<8x128xf32> to vector<8x32xf32>
    %339 = vector.extract_strided_slice %336 {offsets = [0, 32], sizes = [8, 32], strides = [1, 1]} : vector<8x128xf32> to vector<8x32xf32>
    %340 = vector.extract_strided_slice %337 {offsets = [0, 64], sizes = [8, 32], strides = [1, 1]} : vector<8x128xf32> to vector<8x32xf32>
    %341 = vector.extract_strided_slice %336 {offsets = [0, 96], sizes = [8, 32], strides = [1, 1]} : vector<8x128xf32> to vector<8x32xf32>
    %342 = arith.mulf %339, %302 : vector<8x32xf32>
    %343 = arith.mulf %338, %340 : vector<8x32xf32>
    %344 = arith.addf %342, %343 : vector<8x32xf32>
    %345 = math.tanh %344 : vector<8x32xf32>
    %346 = arith.mulf %341, %345 : vector<8x32xf32>
    %347 = arith.index_cast %c7_i32 : i32 to index
    %c0_78 = arith.constant 0 : index
    %c0_79 = arith.constant 0 : index
    %348 = vector.load %arg11[%347, %c0_78, %c0_79] : memref<8x8x32xf32, #tpu.memory_space<vmem>>, vector<1x8x32xf32>
    %349 = vector.shape_cast %348 : vector<1x8x32xf32> to vector<8x32xf32>
    %350 = vector.shape_cast %346 : vector<8x32xf32> to vector<1x8x32xf32>
    tpu.vector_store %arg11[%347, %c0_78, %c0_79], %350 {strides = array<i32>} : memref<8x8x32xf32, #tpu.memory_space<vmem>>, vector<1x8x32xf32>,
    %c8_i32 = arith.constant 8 : i32
    %c0_80 = arith.constant 0 : index
    %c0_81 = arith.constant 0 : index
    %c0_82 = arith.constant 0 : index
    %351 = vector.load %arg11[%c0_80, %c0_81, %c0_82] : memref<8x8x32xf32, #tpu.memory_space<vmem>>, vector<8x8x32xf32>
    %352 = vector.shape_cast %351 : vector<8x8x32xf32> to vector<64x32xf32>
    %c0_83 = arith.constant 0 : index
    %c0_84 = arith.constant 0 : index
    %353 = vector.load %arg7[%c0_83, %c0_84] : memref<32x1xf32, #tpu.memory_space<vmem>>, vector<32x1xf32>
    %cst_85 = arith.constant dense<0.000000e+00> : vector<64x1xf32>
    %354 = tpu.matmul %352, %353, %cst_85 {dimension_numbers = #tpu.dot_dimension_numbers<[1], [0], [0], [1], [0, 0, 1, 1], [], []>} : vector<64x32xf32>, vector<32x1xf32>, vector<64x1xf32> -> vector<64x1xf32>
    %c0_86 = arith.constant 0 : index
    %c0_87 = arith.constant 0 : index
    %355 = vector.load %arg8[%c0_86, %c0_87] : memref<1x1xf32, #tpu.memory_space<vmem>>, vector<1x1xf32>
    %356 = vector.broadcast %355 : vector<1x1xf32> to vector<64x1xf32>
    %357 = arith.addf %354, %356 : vector<64x1xf32>
    %358 = vector.shape_cast %357 : vector<64x1xf32> to vector<8x8x1xf32>
    %c0_88 = arith.constant 0 : index
    %c0_89 = arith.constant 0 : index
    %c0_90 = arith.constant 0 : index
    %359 = vector.load %arg9[%c0_88, %c0_89, %c0_90] : memref<8x8x1xf32, #tpu.memory_space<vmem>>, vector<8x8x1xf32>
    tpu.vector_store %arg9[%c0_88, %c0_89, %c0_90], %358 {strides = array<i32>} : memref<8x8x1xf32, #tpu.memory_space<vmem>>, vector<8x8x1xf32>,
    return
  }
  func.func @transform_0(%arg0: i32) -> (i32, i32, i32) {
    %c0_i32 = arith.constant 0 : i32
    %c0_i32_0 = arith.constant 0 : i32
    %c0_i32_1 = arith.constant 0 : i32
    %c0_i32_2 = arith.constant 0 : i32
    return %c0_i32, %c0_i32_0, %c0_i32_1 : i32, i32, i32
  }
  func.func @transform_1(%arg0: i32) -> (i32, i32) {
    %c0_i32 = arith.constant 0 : i32
    %c0_i32_0 = arith.constant 0 : i32
    %c0_i32_1 = arith.constant 0 : i32
    return %c0_i32, %c0_i32_0 : i32, i32
  }
  func.func @transform_2(%arg0: i32) -> (i32, i32) {
    %c0_i32 = arith.constant 0 : i32
    %c0_i32_0 = arith.constant 0 : i32
    %c0_i32_1 = arith.constant 0 : i32
    return %c0_i32, %c0_i32_0 : i32, i32
  }
  func.func @transform_3(%arg0: i32) -> (i32, i32) {
    %c0_i32 = arith.constant 0 : i32
    %c0_i32_0 = arith.constant 0 : i32
    %c0_i32_1 = arith.constant 0 : i32
    return %c0_i32, %c0_i32_0 : i32, i32
  }
  func.func @transform_4(%arg0: i32) -> (i32, i32) {
    %c0_i32 = arith.constant 0 : i32
    %c0_i32_0 = arith.constant 0 : i32
    %c0_i32_1 = arith.constant 0 : i32
    return %c0_i32, %c0_i32_0 : i32, i32
  }
  func.func @transform_5(%arg0: i32) -> (i32, i32) {
    %c0_i32 = arith.constant 0 : i32
    %c0_i32_0 = arith.constant 0 : i32
    %c0_i32_1 = arith.constant 0 : i32
    return %c0_i32, %c0_i32_0 : i32, i32
  }
  func.func @transform_6(%arg0: i32) -> (i32, i32) {
    %c0_i32 = arith.constant 0 : i32
    %c0_i32_0 = arith.constant 0 : i32
    %c0_i32_1 = arith.constant 0 : i32
    return %c0_i32, %c0_i32_0 : i32, i32
  }
  func.func @transform_7(%arg0: i32) -> (i32, i32) {
    %c0_i32 = arith.constant 0 : i32
    %c0_i32_0 = arith.constant 0 : i32
    %c0_i32_1 = arith.constant 0 : i32
    return %c0_i32, %c0_i32_0 : i32, i32
  }
  func.func @transform_8(%arg0: i32) -> (i32, i32, i32) {
    %c0_i32 = arith.constant 0 : i32
    %c0_i32_0 = arith.constant 0 : i32
    %c0_i32_1 = arith.constant 0 : i32
    %c0_i32_2 = arith.constant 0 : i32
    return %c0_i32, %c0_i32_0, %c0_i32_1 : i32, i32, i32
  }
}

</mosaic_0001>

<bundles_post_ra>
// kernel: lstm_module_forward.1
= control target key start
LH: loop header
LB: loop body
LE: loop exit
PB: predicated region body
PF: predicated region fallthrough
CT: control target
= control target key end

     0   :  { %vm47_vm0 = vcmask 64512   ;;  %v2646_v0 = vmov 0.0   ;;  %vm2647_vm1 = vmmov 0   ;;  %s2648_s20 = smov 64   ;;  %s2649_s21 = smov 32   ;;  %vm205_vm2 = vcmask 261120   ;;  %s3323_s1 = inlined_call_operand.vmem [shape: f32[8,128], index: 1, kind: input, shape index: {}]   ;;  %s3324_s2 = inlined_call_operand.vmem [shape: f32[32,128], index: 2, kind: input, shape index: {}]   ;;  %s3325_s0 = inlined_call_operand.vmem [shape: f32[8,8,8], index: 0, kind: input, shape index: {}]   ;;  %s3326_s3 = inlined_call_operand.vmem [shape: f32[1,128], index: 3, kind: input, shape index: {}]   ;;  %s3327_s4 = inlined_call_operand.vmem [shape: f32[64,128], index: 4, kind: input, shape index: {}]   ;;  %s3328_s5 = inlined_call_operand.vmem [shape: f32[1,128], index: 5, kind: input, shape index: {}]   ;;  %s3329_s6 = inlined_call_operand.vmem [shape: f32[32,1], index: 6, kind: input, shape index: {}]   ;;  %s3330_s7 = inlined_call_operand.<no memory space> [shape: f32[1,1], index: 7, kind: input, shape index: {}]   ;;  %s3331_s8 = inlined_call_operand.vmem [shape: f32[8,8,1], index: 8, kind: output, shape index: {}]  }
   0x1   :  { %2240 = vmatprep.subr.mxu1 %v2646_v0  ;;  %v39_v1 = vld [vmem:[%s3323_s1] sm:$0xff]  ;;  %v2702_v2 = vld [vmem:[%s3324_s2 + $0x18] sm:$0xff]  ;;  %2248 = vmatprep.mubr.msk.f32.mxu1 %vm2647_vm1, %v2646_v0  ;;  %v32_v4 = vld [vmem:[%s3325_s0 + $0x8] sm:$0xff]  ;;  %vm309_vm3 = vcmask 523264   ;;  %vm2030_vm4 = vcmask 7168  }
   0x2   :  { %v31_v3 = vld [vmem:[%s3325_s0] sm:$0xff]  ;;  %2226 = vmatprep.subr.mxu0 %v39_v1  ;;  %2241 = vmatpush3.msra.mxu1 %v2702_v2  ;;  %v2716_v5 = vld [vmem:[%s3324_s2 + $0x10] sm:$0xff]  ;;  %v2724_v6 = vld [vmem:[%s3324_s2 + $0x8] sm:$0xff] }
   0x3   :  { %2227 = vmatpush3.msra.mxu0 %v39_v1  ;;  %2228 = vmatprep.mubr.msk.f32.mxu0 %vm47_vm0, %v31_v3  ;;  %v2732_v7 = vld [vmem:[%s3324_s2] sm:$0xff]  ;;  %v33_v25 = vld [vmem:[%s3325_s0 + $0x10] sm:$0xff]  ;;  %v34_v26 = vld [vmem:[%s3325_s0 + $0x18] sm:$0xff] }
   0x4   :  { %2242 = vmatprep.subr.mxu1 %v2646_v0  ;;  %2229 = vmatmul.mubr.msk.f32.vlgmr.msra.gmra.mxu0 %vm47_vm0, %v32_v4  ;;  %v2754_v9 = vld [vmem:[%s3326_s3] ss:$0 sm:$0xff]  ;;  %v2771_v27 = vld [vmem:[%s3327_s4 + $0x38] sm:$0xff]  ;;  %v2777_v28 = vld [vmem:[%s3327_s4 + $0x30] sm:$0xff] }
   0x5   :  { %2243 = vmatpush3.msra.mxu1 %v2716_v5  ;;  %2251 = vmatprep.subr.mxu0 %v2646_v0  ;;  %v35_v29 = vld [vmem:[%s3325_s0 + $0x20] sm:$0xff]  ;;  %v2788_v30 = vld [vmem:[%s3327_s4 + $0x28] sm:$0xff]  ;;  %v37_v33 = vld [vmem:[%s3325_s0 + $0x30] sm:$0xff] }
   0x6   :  { %2244 = vmatprep.subr.mxu1 %v2646_v0  ;;  %2231 = vmatprep.mubr.msk.f32.mxu0 %vm47_vm0, %v33_v25  ;;  %v36_v31 = vld [vmem:[%s3325_s0 + $0x28] sm:$0xff]  ;;  %v2799_v32 = vld [vmem:[%s3327_s4 + $0x20] sm:$0xff]  ;;  %v2810_v34 = vld [vmem:[%s3327_s4 + $0x18] sm:$0xff] }
   0x7   :  { %2245 = vmatpush3.msra.mxu1 %v2724_v6  ;;  %2252 = vmatpush3.msra.mxu0 %v2771_v27  ;;  %v38_v35 = vld [vmem:[%s3325_s0 + $0x38] sm:$0xff]  ;;  %v2822_v37 = vld [vmem:[%s3327_s4 + $0x10] sm:$0xff]  ;;  %v2830_v38 = vld [vmem:[%s3327_s4 + $0x8] sm:$0xff] }
   0x8   :  { %2246 = vmatprep.subr.mxu1 %v2646_v0  ;;  %2253 = vmatprep.subr.mxu0 %v2646_v0  ;;  %v2839_v39 = vld [vmem:[%s3327_s4] sm:$0xff] }
   0x9   :  { %2247 = vmatpush3.msra.mxu1 %v2732_v7  ;;  %2232 = vmatmul.mubr.msk.f32.gmra.mxu0 %vm47_vm0, %v34_v26  ;;  %v2894_v51 = vld [vmem:[%s3328_s5] ss:$0 sm:$0xff] }
   0xa   :  { %2249 = vmatmul.mubr.f32.vlgmr.msra.gmra.mxu1 %v2646_v0  ;;  %2270 = vmatprep.subr.mxu1 %v2646_v0 }
   0xb   :  { %2271 = vmatpush3.msra.mxu1 %v2702_v2  ;;  %2278 = vmatprep.mubr.msk.f32.mxu1 %vm2647_vm1, %v2646_v0 }
   0xc   :  { %2272 = vmatprep.subr.mxu1 %v2646_v0  ;;  %2254 = vmatpush3.msra.mxu0 %v2777_v28 }
   0xd   :  { %2273 = vmatpush3.msra.mxu1 %v2716_v5  ;;  %2234 = vmatprep.mubr.msk.f32.mxu0 %vm47_vm0, %v35_v29 }
   0xe   :  { %2274 = vmatprep.subr.mxu1 %v2646_v0  ;;  %2255 = vmatprep.subr.mxu0 %v2646_v0 }
   0xf   :  { %2275 = vmatpush3.msra.mxu1 %v2724_v6  ;;  %2256 = vmatpush3.msra.mxu0 %v2788_v30 }
  0x10   :  { %2276 = vmatprep.subr.mxu1 %v2646_v0  ;;  %2257 = vmatprep.subr.mxu0 %v2646_v0 }
  0x11   :  { %2277 = vmatpush3.msra.mxu1 %v2732_v7  ;;  %2235 = vmatmul.mubr.msk.f32.gmra.mxu0 %vm47_vm0, %v36_v31 }
  0x12   :  { %2281 = vmatprep.subr.mxu1 %v2646_v0  ;;  %2258 = vmatpush3.msra.mxu0 %v2799_v32 }
  0x13   :  { %2237 = vmatprep.mubr.msk.f32.mxu0 %vm47_vm0, %v37_v33  ;;  %2259 = vmatprep.subr.mxu0 %v2646_v0 }
  0x14   :  { %2260 = vmatpush3.msra.mxu0 %v2810_v34 }
  0x15   :  { %2261 = vmatprep.subr.mxu0 %v2646_v0  ;;  %2238 = vmatmul.mubr.msk.f32.gmra.mxu0 %vm47_vm0, %v38_v35 }
  0x16   :  { %2262 = vmatpush3.msra.mxu0 %v2822_v37  ;;  %2267 = vmatprep.mubr.msk.f32.mxu0 %vm2647_vm1, %v2646_v0 }
  0x17   :  { %2263 = vmatprep.subr.mxu0 %v2646_v0 }
  0x18   :  { %2264 = vmatpush3.msra.mxu0 %v2830_v38 }
  0x19   :  { %2265 = vmatprep.subr.mxu0 %v2646_v0 }
  0x1a   :  { %2266 = vmatpush3.msra.mxu0 %v2839_v39 }
  0x1b   :  { %2300 = vmatprep.subr.mxu0 %v2646_v0 }
  0xc4   :  { %v2749_v8 = vpop.f32.mrf.mxu0 }
  0xc5   :  { %v144_v49 = vadd.f32 %v2749_v8, %v2754_v9 }
  0xc6   :  { %v138_v10 = vpop.f32.mrf.mxu0 }
  0xc7   :  { %v139_v11 = vadd.f32 %v2754_v9, %v138_v10 }
  0xc9   :  { %v2877_v44 = vpop.f32.mrf.mxu0 }
  0xca   :  { %v275_v12 = vpop.f32.mrf.mxu1 }
  0xcb   :  { %v279_v13 = vadd.f32 %v275_v12, %v139_v11  ;;  %v2879_v45 = vpop.f32.mrf.mxu0 }
  0xcc   :  { %v2250_v14 = vpop.f32.mrf.mxu1  ;;  %v149_v33 = vadd.f32 %v2754_v9, %v2879_v45 }
  0xcd   :  { %2504 = vtanh.f32 %v279_v13  ;;  %v2053_v16 = vmul.f32 -1.442695, %v279_v13 }
  0xcf   :  { %2506 = vpow2.f32 %v2053_v16 }
  0xd1   :  { %v2881_v46 = vpop.f32.mrf.mxu0 }
  0xd3   :  { %v2883_v47 = vpop.f32.mrf.mxu0 }
  0xd5   :  { %v2885_v48 = vpop.f32.mrf.mxu0 }
  0xd7   :  { %v2889_v50 = vpop.f32.mrf.mxu0 }
  0xda   :  { %v2505_v15 = vpop.eup %2504 }
  0xdb   :  { %289 = vrot.lane.b32.xlu0 %v2505_v15, %s2648_s20 }
  0xdc   :  { %v2507_v17 = vpop.eup %2506 }
  0xdd   :  { %v283_v18 = vadd.f32 1.0, %v2507_v17 }
  0xdf   :  { %2508 = vrcp.f32 %v283_v18 }
  0xec   :  { %v2509_v19 = vpop.eup %2508 }
  0xed   :  { %v287_v22 = vmul.f32 0.0, %v2509_v19 }
 0x14d   :  { %v290_v20 = vpop.permute.xlu0 %289 }
 0x14e   :  { %v292_v21 = vmul.f32 %v2509_v19, %v290_v20 }
 0x150   :  { %294 = vrot.lane.b32.xlu0 %v292_v21, %s2649_s21 }
 0x1c2   :  { %v295_v23 = vpop.permute.xlu0 %294 }
 0x1c3   :  { %v2759_v24 = vadd.f32 %v295_v23, %v287_v22 }
 0x1c5   :  { %2510 = vtanh.f32 %v2759_v24 }
 0x1d2   :  { %v2511_v36 = vpop.eup %2510 }
 0x1d3   :  { %300 = vrot.lane.b32.xlu1 %v2511_v36, %s2648_s20 }
 0x245   :  { %v301_v40 = vpop.permute.xlu1 %300 }
 0x246   :  { %v303_v41 = vmul.f32 %v2509_v19, %v301_v40 }
 0x248   :  { %305 = vrot.lane.b32.xlu1 %v303_v41, %s2649_s21 }
 0x2ba   :  { %v306_v42 = vpop.permute.xlu1 %305 }
 0x2bb   :  { %v308_v43 = vsel %vm205_vm2, %v306_v42, 0.0  ;;  %2279 = vmatmul.mubr.msk.f32.vlgmr.msra.gmra.mxu1 %vm205_vm2, %v306_v42 }
 0x2bc   :  { %2268 = vmatmul.mubr.msk.f32.vlgmr.msra.gmra.mxu0 %vm309_vm3, %v308_v43  ;;  %2282 = vmatpush3.msra.mxu1 %v2771_v27 }
 0x2bd   :  { %2283 = vmatprep.subr.mxu1 %v2646_v0  ;;  %2301 = vmatpush3.msra.mxu0 %v2702_v2 }
 0x2be   :  { %2284 = vmatpush3.msra.mxu1 %v2777_v28  ;;  %2302 = vmatprep.subr.mxu0 %v2646_v0 }
 0x2bf   :  { %2285 = vmatprep.subr.mxu1 %v2646_v0  ;;  %2303 = vmatpush3.msra.mxu0 %v2716_v5 }
 0x2c0   :  { %2286 = vmatpush3.msra.mxu1 %v2788_v30  ;;  %2304 = vmatprep.subr.mxu0 %v2646_v0 }
 0x2c1   :  { %2287 = vmatprep.subr.mxu1 %v2646_v0  ;;  %2305 = vmatpush3.msra.mxu0 %v2724_v6 }
 0x2c2   :  { %2288 = vmatpush3.msra.mxu1 %v2799_v32  ;;  %2306 = vmatprep.subr.mxu0 %v2646_v0 }
 0x2c3   :  { %2289 = vmatprep.subr.mxu1 %v2646_v0  ;;  %2307 = vmatpush3.msra.mxu0 %v2732_v7 }
 0x2c4   :  { %2290 = vmatpush3.msra.mxu1 %v2810_v34  ;;  %2308 = vmatprep.mubr.msk.f32.mxu0 %vm2647_vm1, %v2646_v0 }
 0x2c5   :  { %2291 = vmatprep.subr.mxu1 %v2646_v0  ;;  %2297 = vmatprep.mubr.msk.f32.mxu1 %vm2647_vm1, %v2646_v0 }
 0x2c6   :  { %2292 = vmatpush3.msra.mxu1 %v2822_v37  ;;  %2311 = vmatprep.subr.mxu0 %v2646_v0 }
 0x2c7   :  { %2293 = vmatprep.subr.mxu1 %v2646_v0 }
 0x2c8   :  { %2294 = vmatpush3.msra.mxu1 %v2830_v38 }
 0x2c9   :  { %2295 = vmatprep.subr.mxu1 %v2646_v0 }
 0x2ca   :  { %2296 = vmatpush3.msra.mxu1 %v2839_v39 }
 0x2cb   :  { %2330 = vmatprep.subr.mxu1 %v2646_v0 }
 0x37b   :  { %v482_v52 = vpop.f32.mrf.mxu1 }
 0x37c   :  { %v486_v53 = vadd.f32 %v482_v52, %v144_v49  ;;  %v379_v54 = vpop.f32.mrf.mxu0 }
 0x37d   :  { %v380_v55 = vadd.f32 %v2894_v51, %v379_v54  ;;  %v2280_v56 = vpop.f32.mrf.mxu1 }
 0x37e   :  { %2512 = vtanh.f32 %v486_v53  ;;  %v2269_v57 = vpop.f32.mrf.mxu0  ;;  %v2057_v60 = vmul.f32 -1.442695, %v486_v53 }
 0x37f   :  { %2514 = vtanh.f32 %v380_v55  ;;  %v2055_v61 = vmul.f32 -1.442695, %v380_v55 }
 0x380   :  { %2516 = vpow2.f32 %v2057_v60 }
 0x381   :  { %2518 = vpow2.f32 %v2055_v61 }
 0x38b   :  { %v2513_v58 = vpop.eup %2512 }
 0x38c   :  { %v2515_v59 = vpop.eup %2514  ;;  %496 = vrot.lane.b32.xlu1 %v2513_v58, %s2648_s20 }
 0x38d   :  { %392 = vrot.lane.b32.xlu0 %v2515_v59, %s2648_s20  ;;  %v2517_v62 = vpop.eup %2516 }
 0x38e   :  { %v2519_v63 = vpop.eup %2518  ;;  %v490_v1 = vadd.f32 1.0, %v2517_v62 }
 0x38f   :  { %v386_v3 = vadd.f32 1.0, %v2519_v63 }
 0x390   :  { %2520 = vrcp.f32 %v490_v1 }
 0x391   :  { %2522 = vrcp.f32 %v386_v3 }
 0x39d   :  { %v2521_v4 = vpop.eup %2520 }
 0x39e   :  { %v2523_v10 = vpop.eup %2522  ;;  %v494_v14 = vmul.f32 %v2521_v4, %v2759_v24 }
 0x39f   :  { %v390_v16 = vmul.f32 0.0, %v2523_v10 }
 0x3fe   :  { %v497_v8 = vpop.permute.xlu1 %496 }
 0x3ff   :  { %v499_v11 = vmul.f32 %v2521_v4, %v497_v8  ;;  %v393_v12 = vpop.permute.xlu0 %392 }
 0x400   :  { %v395_v13 = vmul.f32 %v2523_v10, %v393_v12 }
 0x401   :  { %501 = vrot.lane.b32.xlu1 %v499_v11, %s2649_s21 }
 0x402   :  { %397 = vrot.lane.b32.xlu0 %v395_v13, %s2649_s21 }
 0x473   :  { %v502_v15 = vpop.permute.xlu1 %501 }
 0x474   :  { %v2902_v17 = vadd.f32 %v502_v15, %v494_v14  ;;  %v398_v18 = vpop.permute.xlu0 %397 }
 0x475   :  { %v2904_v19 = vadd.f32 %v398_v18, %v390_v16 }
 0x476   :  { %2524 = vtanh.f32 %v2902_v17 }
 0x477   :  { %2526 = vtanh.f32 %v2904_v19 }
 0x483   :  { %v2525_v20 = vpop.eup %2524 }
 0x484   :  { %v2527_v21 = vpop.eup %2526  ;;  %507 = vrot.lane.b32.xlu1 %v2525_v20, %s2648_s20 }
 0x485   :  { %403 = vrot.lane.b32.xlu0 %v2527_v21, %s2648_s20  ;;  %v154_v21 = vadd.f32 %v2877_v44, %v2754_v9 }
 0x4f6   :  { %v508_v22 = vpop.permute.xlu1 %507 }
 0x4f7   :  { %v510_v23 = vmul.f32 %v2521_v4, %v508_v22  ;;  %v404_v24 = vpop.permute.xlu0 %403 }
 0x4f8   :  { %v2910_v25 = vmul.f32 %v2523_v10, %v404_v24 }
 0x4f9   :  { %512 = vrot.lane.b32.xlu0 %v510_v23, %s2649_s21 }
 0x4fa   :  { %515 = vrot.lane.b32.xlu1 %v2910_v25, %s2648_s20 }
 0x56b   :  { %v513_v26 = vpop.permute.xlu0 %512 }
 0x56c   :  { %v516_v29 = vpop.permute.xlu1 %515  ;;  %2309 = vmatmul.mubr.msk.f32.vlgmr.msra.gmra.mxu0 %vm205_vm2, %v513_v26 }
 0x56d   :  { %v518_v31 = vsel %vm205_vm2, %v513_v26, %v516_v29  ;;  %2312 = vmatpush3.msra.mxu0 %v2771_v27  ;;  %2327 = vmatprep.mubr.msk.f32.mxu0 %vm2647_vm1, %v2646_v0 }
 0x56e   :  { %2298 = vmatmul.mubr.msk.f32.vlgmr.msra.gmra.mxu1 %vm309_vm3, %v518_v31  ;;  %2313 = vmatprep.subr.mxu0 %v2646_v0 }
 0x56f   :  { %2314 = vmatpush3.msra.mxu0 %v2777_v28  ;;  %2331 = vmatpush3.msra.mxu1 %v2702_v2 }
 0x570   :  { %2315 = vmatprep.subr.mxu0 %v2646_v0  ;;  %2332 = vmatprep.subr.mxu1 %v2646_v0 }
 0x571   :  { %2316 = vmatpush3.msra.mxu0 %v2788_v30  ;;  %2333 = vmatpush3.msra.mxu1 %v2716_v5 }
 0x572   :  { %2317 = vmatprep.subr.mxu0 %v2646_v0  ;;  %2334 = vmatprep.subr.mxu1 %v2646_v0 }
 0x573   :  { %2318 = vmatpush3.msra.mxu0 %v2799_v32  ;;  %2335 = vmatpush3.msra.mxu1 %v2724_v6 }
 0x574   :  { %2319 = vmatprep.subr.mxu0 %v2646_v0  ;;  %2336 = vmatprep.subr.mxu1 %v2646_v0 }
 0x575   :  { %2320 = vmatpush3.msra.mxu0 %v2810_v34  ;;  %2337 = vmatpush3.msra.mxu1 %v2732_v7 }
 0x576   :  { %2321 = vmatprep.subr.mxu0 %v2646_v0  ;;  %2338 = vmatprep.mubr.msk.f32.mxu1 %vm2647_vm1, %v2646_v0 }
 0x577   :  { %2322 = vmatpush3.msra.mxu0 %v2822_v37  ;;  %2341 = vmatprep.subr.mxu1 %v2646_v0 }
 0x578   :  { %2323 = vmatprep.subr.mxu0 %v2646_v0 }
 0x579   :  { %2324 = vmatpush3.msra.mxu0 %v2830_v38 }
 0x57a   :  { %2325 = vmatprep.subr.mxu0 %v2646_v0 }
 0x57b   :  { %2326 = vmatpush3.msra.mxu0 %v2839_v39 }
 0x57c   :  { %2360 = vmatprep.subr.mxu0 %v2646_v0 }
 0x62c   :  { %v692_v35 = vpop.f32.mrf.mxu0 }
 0x62d   :  { %v696_v36 = vadd.f32 %v692_v35, %v149_v33 }
 0x62e   :  { %v588_v40 = vpop.f32.mrf.mxu1  ;;  %v2310_v41 = vpop.f32.mrf.mxu0 }
 0x62f   :  { %2528 = vtanh.f32 %v696_v36  ;;  %v589_v42 = vadd.f32 %v2894_v51, %v588_v40  ;;  %v2061_v53 = vmul.f32 -1.442695, %v696_v36 }
 0x630   :  { %v2299_v43 = vpop.f32.mrf.mxu1 }
 0x631   :  { %2530 = vtanh.f32 %v589_v42  ;;  %v2059_v54 = vmul.f32 -1.442695, %v589_v42 }
 0x632   :  { %2532 = vpow2.f32 %v2061_v53 }
 0x633   :  { %2534 = vpow2.f32 %v2059_v54 }
 0x63c   :  { %v2529_v49 = vpop.eup %2528 }
 0x63d   :  { %706 = vrot.lane.b32.xlu1 %v2529_v49, %s2648_s20 }
 0x63e   :  { %v2531_v52 = vpop.eup %2530 }
 0x63f   :  { %601 = vrot.lane.b32.xlu0 %v2531_v52, %s2648_s20  ;;  %v2533_v45 = vpop.eup %2532 }
 0x640   :  { %v2535_v55 = vpop.eup %2534  ;;  %v700_v56 = vadd.f32 1.0, %v2533_v45 }
 0x641   :  { %v595_v57 = vadd.f32 1.0, %v2535_v55 }
 0x642   :  { %2536 = vrcp.f32 %v700_v56 }
 0x643   :  { %2538 = vrcp.f32 %v595_v57 }
 0x64f   :  { %v2537_v58 = vpop.eup %2536 }
 0x650   :  { %v2539_v61 = vpop.eup %2538  ;;  %v704_v1 = vmul.f32 %v2537_v58, %v2902_v17 }
 0x651   :  { %v599_v8 = vmul.f32 %v2539_v61, %v2904_v19 }
 0x6af   :  { %v707_v59 = vpop.permute.xlu1 %706 }
 0x6b0   :  { %v709_v60 = vmul.f32 %v2537_v58, %v707_v59 }
 0x6b1   :  { %v602_v62 = vpop.permute.xlu0 %601 }
 0x6b2   :  { %711 = vrot.lane.b32.xlu1 %v709_v60, %s2649_s21  ;;  %v604_v63 = vmul.f32 %v2539_v61, %v602_v62 }
 0x6b4   :  { %606 = vrot.lane.b32.xlu0 %v604_v63, %s2649_s21 }
 0x724   :  { %v712_v3 = vpop.permute.xlu1 %711 }
 0x725   :  { %v2954_v4 = vadd.f32 %v712_v3, %v704_v1 }
 0x726   :  { %v607_v10 = vpop.permute.xlu0 %606 }
 0x727   :  { %2540 = vtanh.f32 %v2954_v4  ;;  %v2958_v11 = vadd.f32 %v607_v10, %v599_v8 }
 0x729   :  { %2542 = vtanh.f32 %v2958_v11 }
 0x734   :  { %v2541_v12 = vpop.eup %2540 }
 0x735   :  { %717 = vrot.lane.b32.xlu1 %v2541_v12, %s2648_s20 }
 0x736   :  { %v2543_v13 = vpop.eup %2542 }
 0x737   :  { %612 = vrot.lane.b32.xlu0 %v2543_v13, %s2648_s20  ;;  %v159_v13 = vadd.f32 %v2754_v9, %v2883_v47 }
 0x7a7   :  { %v718_v14 = vpop.permute.xlu1 %717 }
 0x7a8   :  { %v720_v15 = vmul.f32 %v2537_v58, %v718_v14 }
 0x7a9   :  { %v613_v16 = vpop.permute.xlu0 %612 }
 0x7aa   :  { %722 = vrot.lane.b32.xlu0 %v720_v15, %s2649_s21  ;;  %v2964_v17 = vmul.f32 %v2539_v61, %v613_v16 }
 0x7ac   :  { %725 = vrot.lane.b32.xlu1 %v2964_v17, %s2648_s20 }
 0x81c   :  { %v723_v18 = vpop.permute.xlu0 %722 }
 0x81d   :  { %2339 = vmatmul.mubr.msk.f32.vlgmr.msra.gmra.mxu1 %vm205_vm2, %v723_v18 }
 0x81e   :  { %2342 = vmatpush3.msra.mxu1 %v2771_v27  ;;  %2357 = vmatprep.mubr.msk.f32.mxu1 %vm2647_vm1, %v2646_v0  ;;  %v726_v19 = vpop.permute.xlu1 %725 }
 0x81f   :  { %2343 = vmatprep.subr.mxu1 %v2646_v0  ;;  %v728_v20 = vsel %vm205_vm2, %v723_v18, %v726_v19 }
 0x820   :  { %2344 = vmatpush3.msra.mxu1 %v2777_v28  ;;  %2328 = vmatmul.mubr.msk.f32.vlgmr.msra.gmra.mxu0 %vm309_vm3, %v728_v20 }
 0x821   :  { %2345 = vmatprep.subr.mxu1 %v2646_v0  ;;  %2361 = vmatpush3.msra.mxu0 %v2702_v2 }
 0x822   :  { %2346 = vmatpush3.msra.mxu1 %v2788_v30  ;;  %2362 = vmatprep.subr.mxu0 %v2646_v0 }
 0x823   :  { %2347 = vmatprep.subr.mxu1 %v2646_v0  ;;  %2363 = vmatpush3.msra.mxu0 %v2716_v5 }
 0x824   :  { %2348 = vmatpush3.msra.mxu1 %v2799_v32  ;;  %2364 = vmatprep.subr.mxu0 %v2646_v0 }
 0x825   :  { %2349 = vmatprep.subr.mxu1 %v2646_v0  ;;  %2365 = vmatpush3.msra.mxu0 %v2724_v6 }
 0x826   :  { %2350 = vmatpush3.msra.mxu1 %v2810_v34  ;;  %2366 = vmatprep.subr.mxu0 %v2646_v0 }
 0x827   :  { %2351 = vmatprep.subr.mxu1 %v2646_v0  ;;  %2367 = vmatpush3.msra.mxu0 %v2732_v7 }
 0x828   :  { %2352 = vmatpush3.msra.mxu1 %v2822_v37  ;;  %2368 = vmatprep.mubr.msk.f32.mxu0 %vm2647_vm1, %v2646_v0 }
 0x829   :  { %2353 = vmatprep.subr.mxu1 %v2646_v0  ;;  %2371 = vmatprep.subr.mxu0 %v2646_v0 }
 0x82a   :  { %2354 = vmatpush3.msra.mxu1 %v2830_v38 }
 0x82b   :  { %2355 = vmatprep.subr.mxu1 %v2646_v0 }
 0x82c   :  { %2356 = vmatpush3.msra.mxu1 %v2839_v39 }
 0x82d   :  { %2390 = vmatprep.subr.mxu1 %v2646_v0 }
 0x8dd   :  { %v902_v22 = vpop.f32.mrf.mxu1 }
 0x8de   :  { %v906_v23 = vadd.f32 %v902_v22, %v154_v21 }
 0x8df   :  { %v2340_v24 = vpop.f32.mrf.mxu1 }
 0x8e0   :  { %2544 = vtanh.f32 %v906_v23  ;;  %v798_v26 = vpop.f32.mrf.mxu0  ;;  %v2065_v36 = vmul.f32 -1.442695, %v906_v23 }
 0x8e1   :  { %v799_v29 = vadd.f32 %v2894_v51, %v798_v26 }
 0x8e2   :  { %v2329_v31 = vpop.f32.mrf.mxu0 }
 0x8e3   :  { %2546 = vtanh.f32 %v799_v29  ;;  %v2063_v40 = vmul.f32 -1.442695, %v799_v29 }
 0x8e4   :  { %2548 = vpow2.f32 %v2065_v36 }
 0x8e5   :  { %2550 = vpow2.f32 %v2063_v40 }
 0x8ed   :  { %v2545_v33 = vpop.eup %2544 }
 0x8ee   :  { %916 = vrot.lane.b32.xlu1 %v2545_v33, %s2648_s20 }
 0x8f0   :  { %v2547_v35 = vpop.eup %2546 }
 0x8f1   :  { %811 = vrot.lane.b32.xlu0 %v2547_v35, %s2648_s20  ;;  %v2549_v44 = vpop.eup %2548 }
 0x8f2   :  { %v910_v41 = vadd.f32 1.0, %v2549_v44  ;;  %v2551_v42 = vpop.eup %2550 }
 0x8f3   :  { %v805_v43 = vadd.f32 1.0, %v2551_v42 }
 0x8f4   :  { %2552 = vrcp.f32 %v910_v41 }
 0x8f5   :  { %2554 = vrcp.f32 %v805_v43 }
 0x901   :  { %v2553_v49 = vpop.eup %2552 }
 0x902   :  { %v2555_v54 = vpop.eup %2554  ;;  %v914_v56 = vmul.f32 %v2553_v49, %v2954_v4 }
 0x903   :  { %v809_v59 = vmul.f32 %v2555_v54, %v2958_v11 }
 0x960   :  { %v917_v52 = vpop.permute.xlu1 %916 }
 0x961   :  { %v919_v53 = vmul.f32 %v2553_v49, %v917_v52 }
 0x963   :  { %921 = vrot.lane.b32.xlu1 %v919_v53, %s2649_s21  ;;  %v812_v45 = vpop.permute.xlu0 %811 }
 0x964   :  { %v814_v55 = vmul.f32 %v2555_v54, %v812_v45 }
 0x966   :  { %816 = vrot.lane.b32.xlu0 %v814_v55, %s2649_s21 }
 0x9d5   :  { %v922_v57 = vpop.permute.xlu1 %921 }
 0x9d6   :  { %v3007_v58 = vadd.f32 %v922_v57, %v914_v56 }
 0x9d8   :  { %2556 = vtanh.f32 %v3007_v58  ;;  %v817_v60 = vpop.permute.xlu0 %816 }
 0x9d9   :  { %v3011_v61 = vadd.f32 %v817_v60, %v809_v59 }
 0x9db   :  { %2558 = vtanh.f32 %v3011_v61 }
 0x9e5   :  { %v2557_v62 = vpop.eup %2556 }
 0x9e6   :  { %927 = vrot.lane.b32.xlu1 %v2557_v62, %s2648_s20 }
 0x9e8   :  { %v2559_v63 = vpop.eup %2558 }
 0x9e9   :  { %822 = vrot.lane.b32.xlu0 %v2559_v63, %s2648_s20 }
 0xa58   :  { %v928_v1 = vpop.permute.xlu1 %927 }
 0xa59   :  { %v930_v3 = vmul.f32 %v2553_v49, %v928_v1 }
 0xa5b   :  { %932 = vrot.lane.b32.xlu0 %v930_v3, %s2649_s21  ;;  %v823_v4 = vpop.permute.xlu0 %822 }
 0xa5c   :  { %v3017_v8 = vmul.f32 %v2555_v54, %v823_v4 }
 0xa5e   :  { %935 = vrot.lane.b32.xlu1 %v3017_v8, %s2648_s20 }
 0xacd   :  { %v933_v10 = vpop.permute.xlu0 %932 }
 0xace   :  { %2369 = vmatmul.mubr.msk.f32.vlgmr.msra.gmra.mxu0 %vm205_vm2, %v933_v10 }
 0xacf   :  { %2372 = vmatpush3.msra.mxu0 %v2771_v27  ;;  %2387 = vmatprep.mubr.msk.f32.mxu0 %vm2647_vm1, %v2646_v0 }
 0xad0   :  { %2373 = vmatprep.subr.mxu0 %v2646_v0  ;;  %v936_v11 = vpop.permute.xlu1 %935 }
 0xad1   :  { %2374 = vmatpush3.msra.mxu0 %v2777_v28  ;;  %v938_v12 = vsel %vm205_vm2, %v933_v10, %v936_v11 }
 0xad2   :  { %2375 = vmatprep.subr.mxu0 %v2646_v0  ;;  %2358 = vmatmul.mubr.msk.f32.vlgmr.msra.gmra.mxu1 %vm309_vm3, %v938_v12 }
 0xad3   :  { %2376 = vmatpush3.msra.mxu0 %v2788_v30  ;;  %2391 = vmatpush3.msra.mxu1 %v2702_v2 }
 0xad4   :  { %2377 = vmatprep.subr.mxu0 %v2646_v0  ;;  %2392 = vmatprep.subr.mxu1 %v2646_v0 }
 0xad5   :  { %2378 = vmatpush3.msra.mxu0 %v2799_v32  ;;  %2393 = vmatpush3.msra.mxu1 %v2716_v5 }
 0xad6   :  { %2379 = vmatprep.subr.mxu0 %v2646_v0  ;;  %2394 = vmatprep.subr.mxu1 %v2646_v0 }
 0xad7   :  { %2380 = vmatpush3.msra.mxu0 %v2810_v34  ;;  %2395 = vmatpush3.msra.mxu1 %v2724_v6 }
 0xad8   :  { %2381 = vmatprep.subr.mxu0 %v2646_v0  ;;  %2396 = vmatprep.subr.mxu1 %v2646_v0 }
 0xad9   :  { %2398 = vmatprep.mubr.msk.f32.mxu1 %vm2647_vm1, %v2646_v0  ;;  %2397 = vmatpush3.msra.mxu1 %v2732_v7 }
 0xada   :  { %2382 = vmatpush3.msra.mxu0 %v2822_v37  ;;  %2401 = vmatprep.subr.mxu1 %v2646_v0 }
 0xadb   :  { %2383 = vmatprep.subr.mxu0 %v2646_v0 }
 0xadc   :  { %2384 = vmatpush3.msra.mxu0 %v2830_v38 }
 0xadd   :  { %2385 = vmatprep.subr.mxu0 %v2646_v0 }
 0xade   :  { %2386 = vmatpush3.msra.mxu0 %v2839_v39 }
 0xadf   :  { %2420 = vmatprep.subr.mxu0 %v2646_v0 }
 0xb8e   :  { %v1112_v14 = vpop.f32.mrf.mxu0 }
 0xb8f   :  { %v1116_v15 = vadd.f32 %v1112_v14, %v159_v13 }
 0xb90   :  { %v2370_v16 = vpop.f32.mrf.mxu0 }
 0xb91   :  { %2560 = vtanh.f32 %v1116_v15  ;;  %v2069_v23 = vmul.f32 -1.442695, %v1116_v15 }
 0xb92   :  { %v1008_v18 = vpop.f32.mrf.mxu1 }
 0xb93   :  { %v1009_v19 = vadd.f32 %v2894_v51, %v1008_v18 }
 0xb94   :  { %v2359_v20 = vpop.f32.mrf.mxu1 }
 0xb95   :  { %2562 = vtanh.f32 %v1009_v19  ;;  %v2067_v24 = vmul.f32 -1.442695, %v1009_v19 }
 0xb96   :  { %2564 = vpow2.f32 %v2069_v23 }
 0xb97   :  { %2566 = vpow2.f32 %v2067_v24 }
 0xb9e   :  { %v2561_v21 = vpop.eup %2560 }
 0xb9f   :  { %1126 = vrot.lane.b32.xlu1 %v2561_v21, %s2648_s20 }
 0xba2   :  { %v2563_v22 = vpop.eup %2562 }
 0xba3   :  { %1021 = vrot.lane.b32.xlu0 %v2563_v22, %s2648_s20  ;;  %v2565_v47 = vpop.eup %2564 }
 0xba4   :  { %v1120_v26 = vadd.f32 1.0, %v2565_v47  ;;  %v2567_v29 = vpop.eup %2566 }
 0xba5   :  { %v1015_v31 = vadd.f32 1.0, %v2567_v29 }
 0xba6   :  { %2568 = vrcp.f32 %v1120_v26 }
 0xba7   :  { %2570 = vrcp.f32 %v1015_v31 }
 0xbb3   :  { %v2569_v33 = vpop.eup %2568 }
 0xbb4   :  { %v2571_v40 = vpop.eup %2570  ;;  %v1124_v42 = vmul.f32 %v2569_v33, %v3007_v58 }
 0xbb5   :  { %v1019_v52 = vmul.f32 %v2571_v40, %v3011_v61 }
 0xc11   :  { %v1127_v35 = vpop.permute.xlu1 %1126 }
 0xc12   :  { %v1129_v36 = vmul.f32 %v2569_v33, %v1127_v35 }
 0xc14   :  { %1131 = vrot.lane.b32.xlu1 %v1129_v36, %s2649_s21 }
 0xc15   :  { %v1022_v44 = vpop.permute.xlu0 %1021 }
 0xc16   :  { %v1024_v41 = vmul.f32 %v2571_v40, %v1022_v44 }
 0xc18   :  { %1026 = vrot.lane.b32.xlu0 %v1024_v41, %s2649_s21 }
 0xc86   :  { %v1132_v43 = vpop.permute.xlu1 %1131 }
 0xc87   :  { %v3060_v49 = vadd.f32 %v1132_v43, %v1124_v42 }
 0xc89   :  { %2572 = vtanh.f32 %v3060_v49 }
 0xc8a   :  { %v1027_v53 = vpop.permute.xlu0 %1026 }
 0xc8b   :  { %v3064_v54 = vadd.f32 %v1027_v53, %v1019_v52 }
 0xc8d   :  { %2574 = vtanh.f32 %v3064_v54 }
 0xc96   :  { %v2573_v45 = vpop.eup %2572 }
 0xc97   :  { %1137 = vrot.lane.b32.xlu1 %v2573_v45, %s2648_s20 }
 0xc9a   :  { %v2575_v55 = vpop.eup %2574 }
 0xc9b   :  { %1032 = vrot.lane.b32.xlu0 %v2575_v55, %s2648_s20 }
 0xd09   :  { %v1138_v56 = vpop.permute.xlu1 %1137 }
 0xd0a   :  { %v1140_v57 = vmul.f32 %v2569_v33, %v1138_v56 }
 0xd0c   :  { %1142 = vrot.lane.b32.xlu0 %v1140_v57, %s2649_s21 }
 0xd0d   :  { %v1033_v58 = vpop.permute.xlu0 %1032 }
 0xd0e   :  { %v3070_v59 = vmul.f32 %v2571_v40, %v1033_v58 }
 0xd10   :  { %1145 = vrot.lane.b32.xlu1 %v3070_v59, %s2648_s20 }
 0xd7e   :  { %v1143_v60 = vpop.permute.xlu0 %1142 }
 0xd7f   :  { %2399 = vmatmul.mubr.msk.f32.vlgmr.msra.gmra.mxu1 %vm205_vm2, %v1143_v60 }
 0xd80   :  { %2402 = vmatpush3.msra.mxu1 %v2771_v27  ;;  %2417 = vmatprep.mubr.msk.f32.mxu1 %vm2647_vm1, %v2646_v0 }
 0xd81   :  { %2403 = vmatprep.subr.mxu1 %v2646_v0 }
 0xd82   :  { %2404 = vmatpush3.msra.mxu1 %v2777_v28  ;;  %v1146_v61 = vpop.permute.xlu1 %1145 }
 0xd83   :  { %2405 = vmatprep.subr.mxu1 %v2646_v0  ;;  %v1148_v62 = vsel %vm205_vm2, %v1143_v60, %v1146_v61 }
 0xd84   :  { %2406 = vmatpush3.msra.mxu1 %v2788_v30  ;;  %2388 = vmatmul.mubr.msk.f32.vlgmr.msra.gmra.mxu0 %vm309_vm3, %v1148_v62 }
 0xd85   :  { %2407 = vmatprep.subr.mxu1 %v2646_v0  ;;  %2421 = vmatpush3.msra.mxu0 %v2702_v2  ;;  %v164_v2 = vadd.f32 %v2881_v46, %v2754_v9 }
 0xd86   :  { %2408 = vmatpush3.msra.mxu1 %v2799_v32  ;;  %2422 = vmatprep.subr.mxu0 %v2646_v0 }
 0xd87   :  { %2409 = vmatprep.subr.mxu1 %v2646_v0  ;;  %2423 = vmatpush3.msra.mxu0 %v2716_v5 }
 0xd88   :  { %2410 = vmatpush3.msra.mxu1 %v2810_v34  ;;  %2424 = vmatprep.subr.mxu0 %v2646_v0 }
 0xd89   :  { %2428 = vmatprep.mubr.msk.f32.mxu0 %vm2647_vm1, %v2646_v0  ;;  %2425 = vmatpush3.msra.mxu0 %v2724_v6 }
 0xd8a   :  { %2411 = vmatprep.subr.mxu1 %v2646_v0  ;;  %2426 = vmatprep.subr.mxu0 %v2646_v0 }
 0xd8b   :  { %2412 = vmatpush3.msra.mxu1 %v2822_v37  ;;  %2427 = vmatpush3.msra.mxu0 %v2732_v7 }
 0xd8c   :  { %2413 = vmatprep.subr.mxu1 %v2646_v0  ;;  %2431 = vmatprep.subr.mxu0 %v2646_v0 }
 0xd8d   :  { %2414 = vmatpush3.msra.mxu1 %v2830_v38 }
 0xd8e   :  { %2415 = vmatprep.subr.mxu1 %v2646_v0 }
 0xd8f   :  { %2416 = vmatpush3.msra.mxu1 %v2839_v39 }
 0xd90   :  { %2450 = vmatprep.subr.mxu1 %v2646_v0 }
 0xe3f   :  { %v1322_v5 = vpop.f32.mrf.mxu1 }
 0xe40   :  { %v1326_v6 = vadd.f32 %v1322_v5, %v164_v2 }
 0xe41   :  { %v2400_v63 = vpop.f32.mrf.mxu1 }
 0xe42   :  { %2576 = vtanh.f32 %v1326_v6  ;;  %v2073_v11 = vmul.f32 -1.442695, %v1326_v6 }
 0xe44   :  { %v1218_v7 = vpop.f32.mrf.mxu0 }
 0xe45   :  { %v1219_v1 = vadd.f32 %v2894_v51, %v1218_v7 }
 0xe46   :  { %v2389_v3 = vpop.f32.mrf.mxu0 }
 0xe47   :  { %2578 = vtanh.f32 %v1219_v1  ;;  %v2071_v12 = vmul.f32 -1.442695, %v1219_v1 }
 0xe48   :  { %2580 = vpow2.f32 %v2073_v11 }
 0xe49   :  { %2582 = vpow2.f32 %v2071_v12 }
 0xe4f   :  { %v2577_v4 = vpop.eup %2576 }
 0xe50   :  { %1336 = vrot.lane.b32.xlu1 %v2577_v4, %s2648_s20 }
 0xe54   :  { %v2579_v10 = vpop.eup %2578 }
 0xe55   :  { %1231 = vrot.lane.b32.xlu0 %v2579_v10, %s2648_s20  ;;  %v2581_v46 = vpop.eup %2580 }
 0xe56   :  { %v1330_v13 = vadd.f32 1.0, %v2581_v46  ;;  %v2583_v14 = vpop.eup %2582 }
 0xe57   :  { %v1225_v15 = vadd.f32 1.0, %v2583_v14 }
 0xe58   :  { %2584 = vrcp.f32 %v1330_v13 }
 0xe59   :  { %2586 = vrcp.f32 %v1225_v15 }
 0xe65   :  { %v2585_v16 = vpop.eup %2584 }
 0xe66   :  { %v2587_v20 = vpop.eup %2586  ;;  %v1334_v23 = vmul.f32 %v2585_v16, %v3060_v49 }
 0xe67   :  { %v1229_v26 = vmul.f32 %v2587_v20, %v3064_v54 }
 0xec2   :  { %v1337_v18 = vpop.permute.xlu1 %1336 }
 0xec3   :  { %v1339_v19 = vmul.f32 %v2585_v16, %v1337_v18 }
 0xec5   :  { %1341 = vrot.lane.b32.xlu1 %v1339_v19, %s2649_s21  ;;  %v2636_v19 = vld [vmem:[%s3327_s4 + $0x38] sm:$0xff] }
 0xec7   :  { %v1232_v21 = vpop.permute.xlu0 %1231 }
 0xec8   :  { %v1234_v22 = vmul.f32 %v2587_v20, %v1232_v21  ;;  %v2638_v21 = vld [vmem:[%s3327_s4 + $0x28] sm:$0xff] }
 0xeca   :  { %1236 = vrot.lane.b32.xlu0 %v1234_v22, %s2649_s21 }
 0xf37   :  { %v1342_v24 = vpop.permute.xlu1 %1341 }
 0xf38   :  { %v3113_v47 = vadd.f32 %v1342_v24, %v1334_v23  ;;  %v2639_v24 = vld [vmem:[%s3327_s4 + $0x20] sm:$0xff] }
 0xf3a   :  { %2588 = vtanh.f32 %v3113_v47 }
 0xf3c   :  { %v1237_v29 = vpop.permute.xlu0 %1236 }
 0xf3d   :  { %v3117_v31 = vadd.f32 %v1237_v29, %v1229_v26  ;;  %v2641_v26 = vld [vmem:[%s3327_s4 + $0x10] sm:$0xff]  ;;  %v2642_v29 = vld [vmem:[%s3327_s4 + $0x8] sm:$0xff] }
 0xf3f   :  { %2590 = vtanh.f32 %v3117_v31 }
 0xf47   :  { %v2589_v33 = vpop.eup %2588 }
 0xf48   :  { %1347 = vrot.lane.b32.xlu1 %v2589_v33, %s2648_s20  ;;  %v2644_v33 = vld [vmem:[%s3326_s3] ss:$0 sm:$0xff] }
 0xf4c   :  { %v2591_v35 = vpop.eup %2590 }
 0xf4d   :  { %1242 = vrot.lane.b32.xlu0 %v2591_v35, %s2648_s20  ;;  %v174_v35 = vadd.f32 %v2644_v33, %v2885_v48  ;;  %v13_v33 = vstv %s3330_s7 }
 0xf4e   :  { %14 = vst [vmem:[#allocation4] sm:$0x1] %v13_v33 }
 0xfba   :  { %v1348_v36 = vpop.permute.xlu1 %1347 }
 0xfbb   :  { %v1350_v40 = vmul.f32 %v2585_v16, %v1348_v36 }
 0xfbd   :  { %1352 = vrot.lane.b32.xlu0 %v1350_v40, %s2649_s21 }
 0xfbf   :  { %v1243_v44 = vpop.permute.xlu0 %1242 }
 0xfc0   :  { %v3123_v41 = vmul.f32 %v2587_v20, %v1243_v44  ;;  %v2637_v20 = vld [vmem:[%s3327_s4 + $0x30] sm:$0xff] }
 0xfc2   :  { %1355 = vrot.lane.b32.xlu1 %v3123_v41, %s2648_s20 }
0x102f   :  { %v1353_v42 = vpop.permute.xlu0 %1352 }
0x1030   :  { %2429 = vmatmul.mubr.msk.f32.vlgmr.msra.gmra.mxu0 %vm205_vm2, %v1353_v42 }
0x1031   :  { %2432 = vmatpush3.msra.mxu0 %v2771_v27  ;;  %2447 = vmatprep.mubr.msk.f32.mxu0 %vm2647_vm1, %v2646_v0  ;;  %v2632_v27 = vld [vmem:[%s3324_s2 + $0x18] sm:$0xff] }
0x1032   :  { %2433 = vmatprep.subr.mxu0 %v2646_v0 }
0x1033   :  { %2434 = vmatpush3.msra.mxu0 %v2777_v28  ;;  %v2633_v28 = vld [vmem:[%s3324_s2 + $0x10] sm:$0xff] }
0x1034   :  { %2435 = vmatprep.subr.mxu0 %v2646_v0  ;;  %v1356_v43 = vpop.permute.xlu1 %1355 }
0x1035   :  { %2436 = vmatpush3.msra.mxu0 %v2788_v30  ;;  %v1358_v49 = vsel %vm205_vm2, %v1353_v42, %v1356_v43  ;;  %v2634_v30 = vld [vmem:[%s3324_s2 + $0x8] sm:$0xff] }
0x1036   :  { %2437 = vmatprep.subr.mxu0 %v2646_v0  ;;  %2418 = vmatmul.mubr.msk.f32.vlgmr.msra.gmra.mxu1 %vm309_vm3, %v1358_v49 }
0x1037   :  { %2438 = vmatpush3.msra.mxu0 %v2799_v32  ;;  %2451 = vmatpush3.msra.mxu1 %v2632_v27  ;;  %v2635_v32 = vld [vmem:[%s3324_s2] sm:$0xff] }
0x1038   :  { %2439 = vmatprep.subr.mxu0 %v2646_v0  ;;  %2452 = vmatprep.subr.mxu1 %v2646_v0 }
0x1039   :  { %2458 = vmatprep.mubr.msk.f32.mxu1 %vm2647_vm1, %v2646_v0  ;;  %2453 = vmatpush3.msra.mxu1 %v2633_v28 }
0x103a   :  { %2440 = vmatpush3.msra.mxu0 %v2810_v34  ;;  %2454 = vmatprep.subr.mxu1 %v2646_v0  ;;  %v169_v34 = vadd.f32 %v2754_v9, %v2889_v50 }
0x103b   :  { %2441 = vmatprep.subr.mxu0 %v2646_v0  ;;  %2455 = vmatpush3.msra.mxu1 %v2634_v30 }
0x103c   :  { %2442 = vmatpush3.msra.mxu0 %v2822_v37  ;;  %2456 = vmatprep.subr.mxu1 %v2646_v0 }
0x103d   :  { %2443 = vmatprep.subr.mxu0 %v2646_v0  ;;  %2457 = vmatpush3.msra.mxu1 %v2635_v32 }
0x103e   :  { %2444 = vmatpush3.msra.mxu0 %v2830_v38  ;;  %2461 = vmatprep.subr.mxu1 %v2646_v0 }
0x103f   :  { %2445 = vmatprep.subr.mxu0 %v2646_v0 }
0x1040   :  { %2446 = vmatpush3.msra.mxu0 %v2839_v39 }
0x10f0   :  { %v1532_v37 = vpop.f32.mrf.mxu0 }
0x10f1   :  { %v1536_v52 = vadd.f32 %v1532_v37, %v169_v34 }
0x10f2   :  { %v2430_v53 = vpop.f32.mrf.mxu0 }
0x10f3   :  { %2592 = vtanh.f32 %v1536_v52  ;;  %v2077_v57 = vmul.f32 -1.442695, %v1536_v52 }
0x10f6   :  { %v1428_v54 = vpop.f32.mrf.mxu1 }
0x10f7   :  { %v1429_v45 = vadd.f32 %v2894_v51, %v1428_v54 }
0x10f8   :  { %v2419_v55 = vpop.f32.mrf.mxu1 }
0x10f9   :  { %2594 = vtanh.f32 %v1429_v45  ;;  %v2075_v39 = vmul.f32 -1.442695, %v1429_v45 }
0x10fa   :  { %2596 = vpow2.f32 %v2077_v57 }
0x10fb   :  { %2598 = vpow2.f32 %v2075_v39 }
0x1100   :  { %v2593_v56 = vpop.eup %2592 }
0x1101   :  { %1546 = vrot.lane.b32.xlu1 %v2593_v56, %s2648_s20 }
0x1106   :  { %v2595_v38 = vpop.eup %2594 }
0x1107   :  { %1441 = vrot.lane.b32.xlu0 %v2595_v38, %s2648_s20  ;;  %v2597_v9 = vpop.eup %2596 }
0x1108   :  { %v1540_v50 = vadd.f32 1.0, %v2597_v9  ;;  %v2599_v58 = vpop.eup %2598 }
0x1109   :  { %v1435_v60 = vadd.f32 1.0, %v2599_v58 }
0x110a   :  { %2600 = vrcp.f32 %v1540_v50 }
0x110b   :  { %2602 = vrcp.f32 %v1435_v60 }
0x1117   :  { %v2601_v61 = vpop.eup %2600 }
0x1118   :  { %v2603_v5 = vpop.eup %2602  ;;  %v1544_v7 = vmul.f32 %v2601_v61, %v3113_v47  ;;  %v2640_v47 = vld [vmem:[%s3327_s4 + $0x18] sm:$0xff] }
0x1119   :  { %v1439_v4 = vmul.f32 %v2603_v5, %v3117_v31  ;;  %v2643_v31 = vld [vmem:[%s3327_s4] sm:$0xff] }
0x1173   :  { %v1547_v62 = vpop.permute.xlu1 %1546 }
0x1174   :  { %v1549_v2 = vmul.f32 %v2601_v61, %v1547_v62 }
0x1176   :  { %1551 = vrot.lane.b32.xlu1 %v1549_v2, %s2649_s21 }
0x1179   :  { %v1442_v6 = vpop.permute.xlu0 %1441 }
0x117a   :  { %v1444_v63 = vmul.f32 %v2603_v5, %v1442_v6 }
0x117c   :  { %1446 = vrot.lane.b32.xlu0 %v1444_v63, %s2649_s21 }
0x11e8   :  { %v1552_v1 = vpop.permute.xlu1 %1551 }
0x11e9   :  { %v3173_v3 = vadd.f32 %v1552_v1, %v1544_v7 }
0x11eb   :  { %2604 = vtanh.f32 %v3173_v3 }
0x11ee   :  { %v1447_v10 = vpop.permute.xlu0 %1446 }
0x11ef   :  { %v3177_v11 = vadd.f32 %v1447_v10, %v1439_v4 }
0x11f1   :  { %2606 = vtanh.f32 %v3177_v11 }
0x11f8   :  { %v2605_v12 = vpop.eup %2604 }
0x11f9   :  { %1557 = vrot.lane.b32.xlu1 %v2605_v12, %s2648_s20 }
0x11fe   :  { %v2607_v46 = vpop.eup %2606 }
0x11ff   :  { %1452 = vrot.lane.b32.xlu0 %v2607_v46, %s2648_s20 }
0x126b   :  { %v1558_v13 = vpop.permute.xlu1 %1557 }
0x126c   :  { %v1560_v14 = vmul.f32 %v2601_v61, %v1558_v13 }
0x126e   :  { %1562 = vrot.lane.b32.xlu0 %v1560_v14, %s2649_s21 }
0x1271   :  { %v1453_v15 = vpop.permute.xlu0 %1452 }
0x1272   :  { %v3183_v16 = vmul.f32 %v2603_v5, %v1453_v15 }
0x1274   :  { %1565 = vrot.lane.b32.xlu1 %v3183_v16, %s2648_s20 }
0x12e0   :  { %v1563_v18 = vpop.permute.xlu0 %1562 }
0x12e1   :  { %2459 = vmatmul.mubr.msk.f32.vlgmr.msra.gmra.mxu1 %vm205_vm2, %v1563_v18 }
0x12e2   :  { %2462 = vmatpush3.msra.mxu1 %v2636_v19  ;;  %2477 = vmatprep.mubr.msk.f32.mxu1 %vm2647_vm1, %v2646_v0 }
0x12e3   :  { %2463 = vmatprep.subr.mxu1 %v2646_v0 }
0x12e4   :  { %2464 = vmatpush3.msra.mxu1 %v2637_v20 }
0x12e5   :  { %2465 = vmatprep.subr.mxu1 %v2646_v0 }
0x12e6   :  { %2466 = vmatpush3.msra.mxu1 %v2638_v21  ;;  %v1566_v22 = vpop.permute.xlu1 %1565 }
0x12e7   :  { %2467 = vmatprep.subr.mxu1 %v2646_v0  ;;  %v1568_v23 = vsel %vm205_vm2, %v1563_v18, %v1566_v22 }
0x12e8   :  { %2468 = vmatpush3.msra.mxu1 %v2639_v24  ;;  %2448 = vmatmul.mubr.msk.f32.vlgmr.msra.gmra.mxu0 %vm309_vm3, %v1568_v23  ;;  %v1893_v23 = vld [vmem:[%s3329_s6 + $0x18] sm:$0xff] }
0x12e9   :  { %2469 = vmatprep.subr.mxu1 %v2646_v0  ;;  %2480 = vmatprep.subr.mxu0 %v1893_v23 }
0x12ea   :  { %2470 = vmatpush3.msra.mxu1 %v2640_v47  ;;  %2481 = vmatpush3.msra.mxu0 %v1893_v23 }
0x12eb   :  { %2471 = vmatprep.subr.mxu1 %v2646_v0 }
0x12ec   :  { %2472 = vmatpush3.msra.mxu1 %v2641_v26  ;;  %v1890_v26 = vld [vmem:[%s3329_s6] sm:$0xff] }
0x12ed   :  { %2473 = vmatprep.subr.mxu1 %v2646_v0 }
0x12ee   :  { %2474 = vmatpush3.msra.mxu1 %v2642_v29 }
0x12ef   :  { %2475 = vmatprep.subr.mxu1 %v2646_v0 }
0x12f0   :  { %2476 = vmatpush3.msra.mxu1 %v2643_v31 }
0x13a1   :  { %v1742_v36 = vpop.f32.mrf.mxu1 }
0x13a2   :  { %v1746_v40 = vadd.f32 %v1742_v36, %v174_v35 }
0x13a3   :  { %v2460_v44 = vpop.f32.mrf.mxu1 }
0x13a4   :  { %2608 = vtanh.f32 %v1746_v40  ;;  %v2081_v28 = vmul.f32 -1.442695, %v1746_v40 }
0x13a8   :  { %v1638_v42 = vpop.f32.mrf.mxu0 }
0x13a9   :  { %v1639_v43 = vadd.f32 %v2894_v51, %v1638_v42 }
0x13aa   :  { %v2449_v49 = vpop.f32.mrf.mxu0 }
0x13ab   :  { %2610 = vtanh.f32 %v1639_v43  ;;  %v2079_v30 = vmul.f32 -1.442695, %v1639_v43 }
0x13ac   :  { %2612 = vpow2.f32 %v2081_v28 }
0x13ad   :  { %2614 = vpow2.f32 %v2079_v30  ;;  %v2084_v30 = vld [vmem:[#allocation4] ss:$0 sm:$0xff] }
0x13b1   :  { %v2609_v0 = vpop.eup %2608 }
0x13b2   :  { %1756 = vrot.lane.b32.xlu1 %v2609_v0, %s2648_s20 }
0x13b8   :  { %v2611_v27 = vpop.eup %2610 }
0x13b9   :  { %1651 = vrot.lane.b32.xlu0 %v2611_v27, %s2648_s20  ;;  %v2613_v48 = vpop.eup %2612 }
0x13ba   :  { %v1750_v32 = vadd.f32 1.0, %v2613_v48  ;;  %v2615_v34 = vpop.eup %2614 }
0x13bb   :  { %v1645_v37 = vadd.f32 1.0, %v2615_v34 }
0x13bc   :  { %2616 = vrcp.f32 %v1750_v32 }
0x13bd   :  { %2618 = vrcp.f32 %v1645_v37 }
0x13c9   :  { %v2617_v52 = vpop.eup %2616 }
0x13ca   :  { %v2619_v54 = vpop.eup %2618  ;;  %v1754_v56 = vmul.f32 %v2617_v52, %v3173_v3  ;;  %v2645_v3 = vld [vmem:[%s3328_s5] ss:$0 sm:$0xff] }
0x13cb   :  { %v1649_v39 = vmul.f32 %v2619_v54, %v3177_v11 }
0x1424   :  { %v1757_v51 = vpop.permute.xlu1 %1756 }
0x1425   :  { %v1759_v53 = vmul.f32 %v2617_v52, %v1757_v51 }
0x1427   :  { %1761 = vrot.lane.b32.xlu1 %v1759_v53, %s2649_s21 }
0x142b   :  { %v1652_v45 = vpop.permute.xlu0 %1651 }
0x142c   :  { %v1654_v55 = vmul.f32 %v2619_v54, %v1652_v45 }
0x142e   :  { %1656 = vrot.lane.b32.xlu0 %v1654_v55, %s2649_s21 }
0x1499   :  { %v1762_v38 = vpop.permute.xlu1 %1761 }
0x149a   :  { %v1764_v57 = vadd.f32 %v1762_v38, %v1754_v56 }
0x149c   :  { %2620 = vtanh.f32 %v1764_v57 }
0x14a0   :  { %v1657_v9 = vpop.permute.xlu0 %1656 }
0x14a1   :  { %v1659_v50 = vadd.f32 %v1657_v9, %v1649_v39 }
0x14a3   :  { %2622 = vtanh.f32 %v1659_v50 }
0x14a9   :  { %v2621_v58 = vpop.eup %2620 }
0x14aa   :  { %1767 = vrot.lane.b32.xlu1 %v2621_v58, %s2648_s20 }
0x14b0   :  { %v2623_v60 = vpop.eup %2622 }
0x14b1   :  { %1662 = vrot.lane.b32.xlu0 %v2623_v60, %s2648_s20 }
0x151c   :  { %v1768_v61 = vpop.permute.xlu1 %1767 }
0x151d   :  { %v1770_v62 = vmul.f32 %v2617_v52, %v1768_v61 }
0x151f   :  { %1772 = vrot.lane.b32.xlu0 %v1770_v62, %s2649_s21 }
0x1523   :  { %v1663_v2 = vpop.permute.xlu0 %1662 }
0x1524   :  { %v1665_v5 = vmul.f32 %v2619_v54, %v1663_v2 }
0x1526   :  { %1775 = vrot.lane.b32.xlu1 %v1665_v5, %s2648_s20 }
0x1591   :  { %v1773_v6 = vpop.permute.xlu0 %1772 }
0x1598   :  { %v1776_v63 = vpop.permute.xlu1 %1775 }
0x1599   :  { %v1778_v7 = vsel %vm205_vm2, %v1773_v6, %v1776_v63 }
0x159a   :  { %2478 = vmatmul.mubr.msk.f32.vlgmr.msra.gmra.mxu1 %vm309_vm3, %v1778_v7 }
0x165a   :  { %v1848_v1 = vpop.f32.mrf.mxu1 }
0x165b   :  { %v1849_v4 = vadd.f32 %v2645_v3, %v1848_v1 }
0x165c   :  { %v2479_v10 = vpop.f32.mrf.mxu1 }
0x165d   :  { %2624 = vtanh.f32 %v1849_v4  ;;  %v2083_v12 = vmul.f32 -1.442695, %v1849_v4 }
0x165f   :  { %2626 = vpow2.f32 %v2083_v12 }
0x166a   :  { %v2625_v11 = vpop.eup %2624 }
0x166b   :  { %1861 = vrot.lane.b32.xlu0 %v2625_v11, %s2648_s20 }
0x166c   :  { %v2627_v46 = vpop.eup %2626 }
0x166d   :  { %v1855_v13 = vadd.f32 1.0, %v2627_v46 }
0x166f   :  { %2628 = vrcp.f32 %v1855_v13 }
0x167c   :  { %v2629_v14 = vpop.eup %2628 }
0x167d   :  { %v1859_v19 = vmul.f32 %v2629_v14, %v1659_v50 }
0x16dd   :  { %v1862_v15 = vpop.permute.xlu0 %1861 }
0x16de   :  { %v1864_v18 = vmul.f32 %v2629_v14, %v1862_v15 }
0x16e0   :  { %1866 = vrot.lane.b32.xlu1 %v1864_v18, %s2649_s21 }
0x16e4   :  { %408 = vrot.lane.b32.xlu1 %v2910_v25, %s2649_s21 }
0x16e8   :  { %827 = vrot.lane.b32.xlu1 %v3017_v8, %s2649_s21  ;;  %v1892_v8 = vld [vmem:[%s3329_s6 + $0x10] sm:$0xff] }
0x16e9   :  { %2482 = vmatprep.subr.mxu0 %v1892_v8 }
0x16ea   :  { %2483 = vmatpush3.msra.mxu0 %v1892_v8 }
0x16ec   :  { %1247 = vrot.lane.b32.xlu1 %v3123_v41, %s2649_s21  ;;  %v1891_v41 = vld [vmem:[%s3329_s6 + $0x8] sm:$0xff] }
0x16ed   :  { %2484 = vmatprep.subr.mxu0 %v1891_v41 }
0x16ee   :  { %2485 = vmatpush3.msra.mxu0 %v1891_v41 }
0x16ef   :  { %2486 = vmatprep.subr.mxu0 %v1890_v26 }
0x16f0   :  { %1667 = vrot.lane.b32.xlu1 %v1665_v5, %s2649_s21  ;;  %2487 = vmatpush3.msra.mxu0 %v1890_v26 }
0x1752   :  { %v1867_v20 = vpop.permute.xlu1 %1866 }
0x1753   :  { %v1869_v21 = vadd.f32 %v1867_v20, %v1859_v19 }
0x1755   :  { %2630 = vtanh.f32 %v1869_v21 }
0x1756   :  { %v409_v22 = vpop.permute.xlu1 %408 }
0x1757   :  { %411 = vst.msk [vmem:[#allocation3] sm:$0xff] %vm205_vm2, %v409_v22 }
0x175a   :  { %v828_v25 = vpop.permute.xlu1 %827 }
0x175b   :  { %831 = vst.msk [vmem:[#allocation3 + $0x10] sm:$0xff] %vm205_vm2, %v828_v25 }
0x175e   :  { %v1248_v24 = vpop.permute.xlu1 %1247  ;;  %v1882_v47 = vld [vmem:[#allocation3] sm:$0xff] }
0x175f   :  { %1251 = vst.msk [vmem:[#allocation3 + $0x20] sm:$0xff] %vm205_vm2, %v1248_v24  ;;  %2488 = vmatprep.mubr.msk.f32.mxu0 %vm205_vm2, %v1882_v47 }
0x1762   :  { %v2631_v29 = vpop.eup %2630  ;;  %v1668_v31 = vpop.permute.xlu1 %1667 }
0x1763   :  { %1671 = vst.msk [vmem:[#allocation3 + $0x30] sm:$0xff] %vm205_vm2, %v1668_v31  ;;  %1872 = vrot.lane.b32.xlu0 %v2631_v29, %s2648_s20 }
0x1766   :  { %v1886_v43 = vld [vmem:[#allocation3 + $0x20] sm:$0xff] }
0x1767   :  { %617 = vrot.lane.b32.xlu0 %v2964_v17, %s2649_s21 }
0x176a   :  { %v1888_v0 = vld [vmem:[#allocation3 + $0x30] sm:$0xff] }
0x176b   :  { %1037 = vrot.lane.b32.xlu0 %v3070_v59, %s2649_s21 }
0x176f   :  { %1457 = vrot.lane.b32.xlu0 %v3183_v16, %s2649_s21  ;;  %v1884_v16 = vld [vmem:[#allocation3 + $0x10] sm:$0xff] }
0x17d5   :  { %v1873_v35 = vpop.permute.xlu0 %1872 }
0x17d6   :  { %v1875_v36 = vmul.f32 %v2629_v14, %v1873_v35 }
0x17d8   :  { %1877 = vrot.lane.b32.xlu0 %v1875_v36, %s2649_s21 }
0x17d9   :  { %v618_v40 = vpop.permute.xlu0 %617 }
0x17da   :  { %621 = vst.msk [vmem:[#allocation3 + $0x8] sm:$0xff] %vm205_vm2, %v618_v40 }
0x17dd   :  { %v1038_v44 = vpop.permute.xlu0 %1037 }
0x17de   :  { %1041 = vst.msk [vmem:[#allocation3 + $0x18] sm:$0xff] %vm205_vm2, %v1038_v44 }
0x17e1   :  { %v1458_v17 = vpop.permute.xlu0 %1457  ;;  %v1883_v59 = vld [vmem:[#allocation3 + $0x8] sm:$0xff] }
0x17e2   :  { %1461 = vst.msk [vmem:[#allocation3 + $0x28] sm:$0xff] %vm205_vm2, %v1458_v17  ;;  %2489 = vmatmul.mubr.msk.f32.vlgmr.msra.gmra.mxu0 %vm205_vm2, %v1883_v59 }
0x17e3   :  { %2491 = vmatprep.mubr.msk.f32.mxu0 %vm205_vm2, %v1884_v16 }
0x17e5   :  { %v1885_v42 = vld [vmem:[#allocation3 + $0x18] sm:$0xff] }
0x17e6   :  { %2492 = vmatmul.mubr.msk.f32.gmra.mxu0 %vm205_vm2, %v1885_v42 }
0x17e7   :  { %2494 = vmatprep.mubr.msk.f32.mxu0 %vm205_vm2, %v1886_v43 }
0x17e9   :  { %v1887_v49 = vld [vmem:[#allocation3 + $0x28] sm:$0xff] }
0x17ea   :  { %2495 = vmatmul.mubr.msk.f32.gmra.mxu0 %vm205_vm2, %v1887_v49 }
0x17eb   :  { %2497 = vmatprep.mubr.msk.f32.mxu0 %vm205_vm2, %v1888_v0 }
0x184a   :  { %v1878_v27 = vpop.permute.xlu0 %1877 }
0x184b   :  { %1881 = vst.msk [vmem:[#allocation3 + $0x38] sm:$0xff] %vm205_vm2, %v1878_v27 }
0x1852   :  { %v1889_v28 = vld [vmem:[#allocation3 + $0x38] sm:$0xff] }
0x1853   :  { %2498 = vmatmul.mubr.msk.f32.gmra.mxu0 %vm205_vm2, %v1889_v28 }
0x18a2   :  { %v2490_v48 = vpop.f32.mrf.mxu0 }
0x18a3   :  { %v1997_v32 = vadd.f32 %v2490_v48, %v2084_v30 }
0x18a4   :  { %v1991_v34 = vpop.f32.mrf.mxu0 }
0x18a5   :  { %2032 = vst.msk [vmem:[%s3331_s8 + $0x8] sm:$0xff] %vm2030_vm4, %v1997_v32  ;;  %v1992_v37 = vadd.f32 %v2084_v30, %v1991_v34 }
0x18a6   :  { %v2493_v52 = vpop.f32.mrf.mxu0 }
0x18a7   :  { %2031 = vst.msk [vmem:[%s3331_s8] sm:$0xff] %vm2030_vm4, %v1992_v37  ;;  %v2007_v51 = vadd.f32 %v2493_v52, %v2084_v30 }
0x18a8   :  { %v2001_v53 = vpop.f32.mrf.mxu0 }
0x18a9   :  { %2034 = vst.msk [vmem:[%s3331_s8 + $0x18] sm:$0xff] %vm2030_vm4, %v2007_v51  ;;  %v2002_v54 = vadd.f32 %v2084_v30, %v2001_v53 }
0x18aa   :  { %v2496_v45 = vpop.f32.mrf.mxu0 }
0x18ab   :  { %2033 = vst.msk [vmem:[%s3331_s8 + $0x10] sm:$0xff] %vm2030_vm4, %v2002_v54  ;;  %v2017_v55 = vadd.f32 %v2496_v45, %v2084_v30 }
0x18ac   :  { %v2011_v56 = vpop.f32.mrf.mxu0 }
0x18ad   :  { %2036 = vst.msk [vmem:[%s3331_s8 + $0x28] sm:$0xff] %vm2030_vm4, %v2017_v55  ;;  %v2012_v38 = vadd.f32 %v2084_v30, %v2011_v56 }
0x18af   :  { %2035 = vst.msk [vmem:[%s3331_s8 + $0x20] sm:$0xff] %vm2030_vm4, %v2012_v38 }
0x1913   :  { %v2499_v57 = vpop.f32.mrf.mxu0 }
0x1914   :  { %v2027_v39 = vadd.f32 %v2499_v57, %v2084_v30 }
0x1915   :  { %v2021_v9 = vpop.f32.mrf.mxu0 }
0x1916   :  { %2038 = vst.msk [vmem:[%s3331_s8 + $0x38] sm:$0xff] %vm2030_vm4, %v2027_v39  ;;  %v2022_v50 = vadd.f32 %v2084_v30, %v2021_v9 }
0x1918   :  { %2037 = vst.msk [vmem:[%s3331_s8 + $0x30] sm:$0xff] %vm2030_vm4, %v2022_v50 }

</bundles_post_ra>
